<compile_context>
chip_gen: v6e
topology: v6e:2x2x1
jax: 0.10.0
libtpu: 0.0.40
codegen_flags: <defaults>
</compile_context>

<pallas_src>
import functools

import jax
import jax.numpy as jnp
from jax.experimental import pallas as pl
from jax.experimental.pallas import tpu as pltpu

LANE = 128


def _round_up(x, m):
    return ((x + m - 1) // m) * m


def _default_vmem_limit():
    # Generation-aware scoped-VMEM request: ~half of physical VMEM
    # (v5e/v6e: 128 MiB -> 64 MiB, v7x: 64 MiB -> 32 MiB).  Fall back to a
    # conservative 32 MiB if the query is unavailable.
    try:
        cap = int(pltpu.get_tpu_info().vmem_capacity_bytes)
        if cap <= 0:
            raise ValueError("bad vmem capacity")
    except Exception:  # any failure -> safe default
        cap = 64 * 1024 * 1024
    return min(cap // 2, 96 * 1024 * 1024)


_VMEM_LIMIT = _default_vmem_limit()


def _choose_m_tile(M, Kp, Np):
    """Row tile for the GEMM.  The whole K extent and the whole (small) weight
    stay VMEM-resident, so M (= output-base pixels) is the only tiled axis."""
    if M <= 1024:
        tm = _round_up(M, 16)
        return tm, tm
    budget = int(0.7 * _VMEM_LIMIT)
    for tm in (1024, 512, 256, 128):
        # A + out tiles double-buffered, resident weight double-buffered.
        need = 2 * (tm * Kp * 2 + tm * Np * 4) + 2 * Kp * Np * 2
        if need <= budget:
            return tm, _round_up(M, tm)
    return 128, _round_up(M, 128)


# ----------------------------- Pallas kernels ------------------------------

def _gemm_bn_stats_kernel(a_ref, b_ref, o_ref, s_ref, q_ref):
    # One M-row tile x full K on the MXU, f32 accumulation.
    y = jnp.dot(a_ref[...], b_ref[...], preferred_element_type=jnp.float32)

    # Fused BatchNorm statistics: per-channel sum / sum-of-squares accumulated
    # across the (sequential) M-tile axis -> no separate stats pass.
    @pl.when(pl.program_id(0) == 0)
    def _():
        s_ref[...] = jnp.zeros_like(s_ref)
        q_ref[...] = jnp.zeros_like(q_ref)

    s_ref[...] += jnp.sum(y, axis=0, keepdims=True)
    q_ref[...] += jnp.sum(y * y, axis=0, keepdims=True)

    o_ref[...] = y.astype(o_ref.dtype)          # bf16 out, f32 stats


def _gemm_act_kernel(a_ref, b_ref, o_ref, *, activation):
    y = jnp.dot(a_ref[...], b_ref[...], preferred_element_type=jnp.float32)
    if activation == "tanh":
        y = jnp.tanh(y)
    o_ref[...] = y.astype(o_ref.dtype)


def gemm_pallas(a, b, *, tm, with_stats, activation="none",
                out_dtype=jnp.bfloat16):
    """a: (Mp, Kp) bf16, b: (Kp, Np) bf16, lane-padded.  Single K block; the
    weight BlockSpec has a constant index_map so it is fetched once and stays
    VMEM-resident.  When `with_stats`, the per-channel sum / sum-of-squares of
    the f32 accumulator are emitted as two extra (1, Np) outputs."""
    Mp, Kp = a.shape
    Kb, Np = b.shape
    assert Kb == Kp and Kp % LANE == 0 and Np % LANE == 0 and Mp % tm == 0
    grid = (Mp // tm,)
    in_specs = [pl.BlockSpec((tm, Kp), lambda i: (i, 0)),
                pl.BlockSpec((Kp, Np), lambda i: (0, 0))]   # resident weight
    if with_stats:
        out_shape = (jax.ShapeDtypeStruct((Mp, Np), out_dtype),
                     jax.ShapeDtypeStruct((1, Np), jnp.float32),
                     jax.ShapeDtypeStruct((1, Np), jnp.float32))
        out_specs = [pl.BlockSpec((tm, Np), lambda i: (i, 0)),
                     pl.BlockSpec((1, Np), lambda i: (0, 0)),
                     pl.BlockSpec((1, Np), lambda i: (0, 0))]
        kernel = _gemm_bn_stats_kernel
        # Stats blocks accumulate across the M-tile axis -> sequential axis.
        sem = ("arbitrary",)
    else:
        out_shape = jax.ShapeDtypeStruct((Mp, Np), out_dtype)
        out_specs = pl.BlockSpec((tm, Np), lambda i: (i, 0))
        kernel = functools.partial(_gemm_act_kernel, activation=activation)
        sem = ("parallel",)
    return pl.pallas_call(
        kernel,
        out_shape=out_shape,
        grid_spec=pltpu.PrefetchScalarGridSpec(
            num_scalar_prefetch=0, grid=grid,
            in_specs=in_specs, out_specs=out_specs),
        compiler_params=pltpu.CompilerParams(
            dimension_semantics=sem, vmem_limit_bytes=_VMEM_LIMIT),
    )(a, b)


def _bn_relu_kernel(y_ref, scale_ref, shift_ref, o_ref):
    y = y_ref[...].astype(jnp.float32) * scale_ref[...] + shift_ref[...]
    o_ref[...] = jnp.maximum(y, 0.0).astype(o_ref.dtype)


def bn_relu_pallas(y, scale, shift, *, tm):
    """Normalize + ReLU over a bf16 (Mp, Np) slab; f32 math, bf16 output."""
    Mp, Np = y.shape
    return pl.pallas_call(
        _bn_relu_kernel,
        out_shape=jax.ShapeDtypeStruct((Mp, Np), jnp.bfloat16),
        grid_spec=pltpu.PrefetchScalarGridSpec(
            num_scalar_prefetch=0, grid=(Mp // tm,),
            in_specs=[pl.BlockSpec((tm, Np), lambda i: (i, 0)),
                      pl.BlockSpec((1, Np), lambda i: (0, 0)),
                      pl.BlockSpec((1, Np), lambda i: (0, 0))],
            out_specs=pl.BlockSpec((tm, Np), lambda i: (i, 0))),
        compiler_params=pltpu.CompilerParams(
            dimension_semantics=("parallel",),
            vmem_limit_bytes=_VMEM_LIMIT),
    )(y, scale, shift)


def _bn_scale_shift(s, q, gamma, beta, count, eps=1e-5):
    # Training-mode BatchNorm2d (biased variance), folded into scale/shift.
    inv_n = 1.0 / float(count)
    mean = s * inv_n
    var = jnp.maximum(q * inv_n - mean * mean, 0.0)
    inv_std = jax.lax.rsqrt(var + eps)
    scale = gamma * inv_std
    shift = beta - mean * scale
    return scale, shift


# --------------------- sub-pixel ConvTranspose (s=2,p=1,op=1) ---------------

_TAPS = ((0, 0), (0, 1), (1, 0), (1, 1))     # (da, db) of the 2x2 input window
_PHASES = ((0, 0), (0, 1), (1, 0), (1, 1))   # (oh % 2, ow % 2) output phases


def _window2x2(x):
    """(N,H,W,C) -> (N*H*W, 4*C): per base pixel the 2x2 window
    [x[a,b], x[a,b+1], x[a+1,b], x[a+1,b+1]] (zero past the edge).  This is
    the entire A operand of a stride-2 3x3 ConvTranspose expressed as 4
    sub-pixel convolutions: 4 taps at HxW instead of 9 taps at 2Hx2W."""
    N, H, W, C = x.shape
    xp = jnp.pad(x, ((0, 0), (0, 1), (0, 1), (0, 0)))
    parts = [xp[:, da:da + H, db:db + W, :] for (da, db) in _TAPS]
    return jnp.concatenate(parts, axis=-1).reshape(N * H * W, 4 * C)


def _prep_subpixel_convt_weight(w_pt, cin_pad):
    """ConvTranspose2d(Cin, Cout, 3, 2, 1, 1) weight (Cin, Cout, 3, 3) ->
    one (4*cin_pad, 4*ncp) bf16 GEMM matrix.
    Rows: 4 blocks of cin_pad, one per 2x2-window tap (da, db).
    Cols: 4 blocks of ncp, one per output phase (oh%2, ow%2).
    Transposed-conv index algebra: output (2a+ph, 2b+pw) receives
    x[a+da, b+db] * w_pt[:, :, ph+1-2*da, pw+1-2*db] when the kernel index is
    inside [0, 2]; every other (phase, tap) pair contributes zero."""
    Cin, Cout, KH, KW = w_pt.shape
    assert (KH, KW) == (3, 3)
    ncp = _round_up(Cout, LANE)
    w_mat = jnp.zeros((4 * cin_pad, 4 * ncp), jnp.float32)
    for pi, (ph, pw) in enumerate(_PHASES):
        for ti, (da, db) in enumerate(_TAPS):
            kh = ph + 1 - 2 * da
            kw = pw + 1 - 2 * db
            if 0 <= kh <= 2 and 0 <= kw <= 2:
                w_mat = w_mat.at[ti * cin_pad:ti * cin_pad + Cin,
                                 pi * ncp:pi * ncp + Cout].set(w_pt[:, :, kh, kw])
    return w_mat.astype(jnp.bfloat16)


# ------------------ generic im2col paths (initial / extra layers) -----------

def _im2col(xp, OH, OW, KH, KW):
    N = xp.shape[0]
    C = xp.shape[-1]
    cols = [xp[:, kh:kh + OH, kw:kw + OW, :]
            for kh in range(KH) for kw in range(KW)]
    patches = jnp.stack(cols, axis=3)                  # (N, OH, OW, KH*KW, C)
    return patches.reshape(N * OH * OW, KH * KW * C)


def _convt_patches(x, KH, KW, stride, padding, output_padding):
    """ConvTranspose2d as zero-insertion + pad + flipped direct-conv im2col.
    Only used for the 1x1-latent 'initial' layer (the slab is tiny there)."""
    N, H, W, Cin = x.shape
    Hd = (H - 1) * stride + 1
    Wd = (W - 1) * stride + 1
    xd = jnp.zeros((N, Hd, Wd, Cin), x.dtype).at[:, ::stride, ::stride, :].set(x)
    plo = KH - 1 - padding
    phi = KH - 1 - padding + output_padding
    xp = jnp.pad(xd, ((0, 0), (plo, phi), (plo, phi), (0, 0)))
    OH = Hd + plo + phi - KH + 1
    OW = Wd + plo + phi - KW + 1
    return _im2col(xp, OH, OW, KH, KW), (N, OH, OW)


def _conv_patches(x, KH, KW):
    """Conv2d(3x3, stride=1, pad=1, bias=False) im2col."""
    N, H, W, C = x.shape
    xp = jnp.pad(x, ((0, 0), (1, 1), (1, 1), (0, 0)))
    return _im2col(xp, H, W, KH, KW), (N, H, W)


def _prep_convt_weight_generic(w_pt):
    """(Cin, Cout, KH, KW) -> lane-padded bf16 (Kp, Np) for the generic path.
    Direct-conv equivalent: flip spatial dims, rows ordered (kh, kw, cin)."""
    Cin, Cout, KH, KW = w_pt.shape
    w = jnp.transpose(w_pt[:, :, ::-1, ::-1], (2, 3, 0, 1)).reshape(
        KH * KW * Cin, Cout)
    Kp = _round_up(KH * KW * Cin, LANE)
    Np = _round_up(Cout, LANE)
    return jnp.pad(w, ((0, Kp - KH * KW * Cin),
                       (0, Np - Cout))).astype(jnp.bfloat16)


def _prep_conv_weight(w_pt, cin_pad):
    """(Cout, Cin, 3, 3) -> (9*cin_pad, Np) bf16; rows ordered (kh, kw, cin)
    over the lane-padded input channels."""
    Cout, Cin, KH, KW = w_pt.shape
    w = jnp.zeros((KH, KW, cin_pad, Cout), jnp.float32)
    w = w.at[:, :, :Cin, :].set(jnp.transpose(w_pt, (2, 3, 1, 0)))
    w = w.reshape(KH * KW * cin_pad, Cout)
    Np = _round_up(Cout, LANE)
    return jnp.pad(w, ((0, 0), (0, Np - Cout))).astype(jnp.bfloat16)


def _bn_params(cout):
    ncp = _round_up(cout, LANE)
    # BatchNorm2d defaults: weight=1, bias=0; padded channels keep 1/0 so the
    # (all-zero) padded channels stay exactly zero through BN+ReLU.
    return jnp.ones((1, ncp), jnp.float32), jnp.zeros((1, ncp), jnp.float32)


# ------------------------------ layer runners -------------------------------

def _run_im2col_bn_layer(x, layer):
    """Initial ConvTranspose (generic path) or extra 3x3 Conv, + BN + ReLU."""
    if layer["kind"] == "convt_generic":
        patches, (N, OH, OW) = _convt_patches(
            x, 3, 3, layer["stride"], layer["padding"], layer["output_padding"])
    else:
        patches, (N, OH, OW) = _conv_patches(x, 3, 3)
    M, K = patches.shape
    Kp, Np = layer["w_mat"].shape
    tm, Mp = _choose_m_tile(M, Kp, Np)
    a = jnp.pad(patches, ((0, Mp - M), (0, Kp - K)))
    y, s, q = gemm_pallas(a, layer["w_mat"], tm=tm, with_stats=True)
    scale, shift = _bn_scale_shift(s, q, layer["gamma"], layer["beta"], count=M)
    yb = bn_relu_pallas(y, scale, shift, tm=tm)
    return yb[:M].reshape(N, OH, OW, Np)          # keep lane-padded channels


def _run_subpixel_bn_layer(x, layer):
    """Stride-2 ConvTranspose2d(3,2,1,1) + BN + ReLU via 4 sub-pixel phases
    folded into a single GEMM (phases live in the weight's column blocks)."""
    N, H, W, Cp = x.shape
    a = _window2x2(x)                              # (N*H*W, 4*Cp) bf16
    Kp, Np4 = layer["w_mat"].shape
    assert Kp == 4 * Cp
    ncp = Np4 // 4
    M = N * H * W
    tm, Mp = _choose_m_tile(M, Kp, Np4)
    if Mp != M:
        a = jnp.pad(a, ((0, Mp - M), (0, 0)))
    y, s, q = gemm_pallas(a, layer["w_mat"], tm=tm, with_stats=True)
    # Reduce the 4 phase column groups; total pixel count = 4*M = N*(2H)*(2W).
    s_c = s.reshape(4, ncp).sum(axis=0, keepdims=True)
    q_c = q.reshape(4, ncp).sum(axis=0, keepdims=True)
    scale, shift = _bn_scale_shift(s_c, q_c, layer["gamma"], layer["beta"],
                                   count=4 * M)
    yb = bn_relu_pallas(y, jnp.tile(scale, (1, 4)), jnp.tile(shift, (1, 4)),
                        tm=tm)
    # Interleave the phases back into a (N, 2H, 2W, ncp) image.
    yb = yb[:M].reshape(N, H, W, 2, 2, ncp)
    return yb.transpose(0, 1, 3, 2, 4, 5).reshape(N, 2 * H, 2 * W, ncp)


def _run_final_subpixel_tanh(x, w_mat, nc):
    """Final ConvTranspose2d(cngf, nc, 3, 2, 1, 1) with tanh fused in the GEMM."""
    N, H, W, Cp = x.shape
    a = _window2x2(x)
    Kp, Np4 = w_mat.shape
    assert Kp == 4 * Cp
    ncp = Np4 // 4
    M = N * H * W
    tm, Mp = _choose_m_tile(M, Kp, Np4)
    if Mp != M:
        a = jnp.pad(a, ((0, Mp - M), (0, 0)))
    y = gemm_pallas(a, w_mat, tm=tm, with_stats=False, activation="tanh",
                    out_dtype=jnp.float32)
    y = y[:M].reshape(N, H, W, 2, 2, ncp)
    y = y.transpose(0, 1, 3, 2, 4, 5).reshape(N, 2 * H, 2 * W, ncp)
    return y[..., :nc]


# ------------------------------ DCGAN_G model -------------------------------

def build_dcgan_g_params(key, isize, nz, nc, ngf, n_extra_layers=0):
    assert isize % 16 == 0, "isize has to be a multiple of 16"
    cngf, tisize = ngf // 2, 4
    while tisize != isize:
        cngf *= 2
        tisize *= 2

    def rand_w(k, shape):
        return 0.02 * jax.random.normal(k, shape, jnp.float32)

    layers = []
    key, k = jax.random.split(key)
    # initial: ConvTranspose2d(nz, cngf, 3, 2, 0, 1) + BN + ReLU
    w_raw = rand_w(k, (nz, cngf, 3, 3))
    g, b = _bn_params(cngf)
    layers.append(dict(kind="convt_generic", w_raw=w_raw,
                       w_mat=_prep_convt_weight_generic(w_raw),
                       stride=2, padding=0, output_padding=1,
                       cout=cngf, gamma=g, beta=b))
    csize = 4
    while csize < isize // 2:
        key, k = jax.random.split(key)
        w_raw = rand_w(k, (cngf, cngf // 2, 3, 3))
        g, b = _bn_params(cngf // 2)
        layers.append(dict(kind="convt_subpixel", w_raw=w_raw,
                           w_mat=_prep_subpixel_convt_weight(
                               w_raw, _round_up(cngf, LANE)),
                           cout=cngf // 2, gamma=g, beta=b))
        cngf //= 2
        csize *= 2
    for _ in range(n_extra_layers):
        key, k = jax.random.split(key)
        w_raw = rand_w(k, (cngf, cngf, 3, 3))
        g, b = _bn_params(cngf)
        layers.append(dict(kind="conv", w_raw=w_raw,
                           w_mat=_prep_conv_weight(w_raw, _round_up(cngf, LANE)),
                           cout=cngf, gamma=g, beta=b))
    key, k = jax.random.split(key)
    # final: ConvTranspose2d(cngf, nc, 3, 2, 1, 1) + Tanh (tanh fused in GEMM)
    final_w_raw = rand_w(k, (cngf, nc, 3, 3))
    return dict(layers=layers,
                final_w_raw=final_w_raw,
                final_w_mat=_prep_subpixel_convt_weight(
                    final_w_raw, _round_up(cngf, LANE)),
                nc=nc)


def dcgan_g_forward(x_nchw, params):
    x = jnp.transpose(x_nchw, (0, 2, 3, 1)).astype(jnp.bfloat16)   # -> NHWC
    for layer in params["layers"]:
        if layer["kind"] == "convt_subpixel":
            x = _run_subpixel_bn_layer(x, layer)
        else:
            x = _run_im2col_bn_layer(x, layer)
    y = _run_final_subpixel_tanh(x, params["final_w_mat"], params["nc"])
    return jnp.transpose(y, (0, 3, 1, 2))                          # -> NCHW f32


# ------------------- pure-JAX f32 reference (PyTorch semantics) --------------

def _ref_convt(x, w_pt, stride, padding, output_padding):
    N, H, W, Cin = x.shape
    _, Cout, KH, KW = w_pt.shape
    Hd = (H - 1) * stride + 1
    Wd = (W - 1) * stride + 1
    xd = jnp.zeros((N, Hd, Wd, Cin), x.dtype).at[:, ::stride, ::stride, :].set(x)
    plo = KH - 1 - padding
    phi = KH - 1 - padding + output_padding
    xp = jnp.pad(xd, ((0, 0), (plo, phi), (plo, phi), (0, 0)))
    OH = Hd + plo + phi - KH + 1
    OW = Wd + plo + phi - KW + 1
    wf = jnp.transpose(w_pt[:, :, ::-1, ::-1], (2, 3, 0, 1))   # (KH,KW,Cin,Cout)
    out = jnp.zeros((N, OH, OW, Cout), jnp.float32)
    for kh in range(KH):
        for kw in range(KW):
            out = out + jnp.einsum("nhwc,cd->nhwd",
                                   xp[:, kh:kh + OH, kw:kw + OW, :], wf[kh, kw])
    return out


def _ref_conv3x3(x, w_pt):
    N, H, W, _ = x.shape
    Cout = w_pt.shape[0]
    xp = jnp.pad(x, ((0, 0), (1, 1), (1, 1), (0, 0)))
    wt = jnp.transpose(w_pt, (2, 3, 1, 0))
    out = jnp.zeros((N, H, W, Cout), jnp.float32)
    for kh in range(3):
        for kw in range(3):
            out = out + jnp.einsum("nhwc,cd->nhwd",
                                   xp[:, kh:kh + H, kw:kw + W, :], wt[kh, kw])
    return out


def _ref_bn_relu(y, eps=1e-5):
    mean = jnp.mean(y, axis=(0, 1, 2))
    var = jnp.var(y, axis=(0, 1, 2))
    return jnp.maximum((y - mean) * jax.lax.rsqrt(var + eps), 0.0)


def dcgan_g_reference(x_nchw, params):
    x = jnp.transpose(x_nchw, (0, 2, 3, 1)).astype(jnp.float32)
    for layer in params["layers"]:
        if layer["kind"] == "conv":
            y = _ref_conv3x3(x, layer["w_raw"])
        elif layer["kind"] == "convt_generic":
            y = _ref_convt(x, layer["w_raw"], layer["stride"],
                           layer["padding"], layer["output_padding"])
        else:  # convt_subpixel == ConvTranspose2d(3, 2, 1, 1)
            y = _ref_convt(x, layer["w_raw"], 2, 1, 1)
        x = _ref_bn_relu(y)
    y = jnp.tanh(_ref_convt(x, params["final_w_raw"], 2, 1, 1))
    return jnp.transpose(y, (0, 3, 1, 2))


if __name__ == "__main__":
    key = jax.random.PRNGKey(0)
    isize, nz, nc, ngf = 16, 8, 3, 8      # small shapes consistent w/ module
    batch = 2
    kx, kp = jax.random.split(key)
    x = jax.random.normal(kx, (batch, nz, 1, 1), jnp.float32)   # NCHW latent
    params = build_dcgan_g_params(kp, isize, nz, nc, ngf, n_extra_layers=0)

    out = jax.jit(lambda inp: dcgan_g_forward(inp, params))(x)
    out = jax.block_until_ready(out)

    assert out.shape == (batch, nc, isize, isize), out.shape
    assert bool(jnp.all(jnp.isfinite(out)))
    assert bool(jnp.all(jnp.abs(out) <= 1.0))   # tanh output range

    # bf16 Pallas path vs. f32 pure-JAX reference (same PyTorch semantics).
    ref = jax.jit(lambda inp: dcgan_g_reference(inp, params))(x)
    ref = jax.block_until_ready(ref)
    err = float(jnp.max(jnp.abs(out - ref)))
    assert err < 8e-2, f"max |pallas - reference| = {err}"

    print("KERNEL_OK")
</pallas_src>

<mosaic_0001>
module attributes {stable_mosaic.version = 11 : i64} {
  func.func @_gemm_bn_stats_kernel(%arg0: i32, %arg1: memref<32x128xbf16, #tpu.memory_space<vmem>>, %arg2: memref<128x128xbf16, #tpu.memory_space<vmem>>, %arg3: memref<32x128xbf16, #tpu.memory_space<vmem>>, %arg4: memref<1x128xf32, #tpu.memory_space<vmem>>, %arg5: memref<1x128xf32, #tpu.memory_space<vmem>>) attributes {dimension_semantics = [#tpu.dimension_semantics<arbitrary>], iteration_bounds = array<i64: 1>, scalar_prefetch = 0 : i64, scratch_operands = 0 : i64, tpu.core_type = #tpu.core_type<tc>, window_params = [{transform_indices = @transform_0, window_bounds = array<i64: 32, 128>}, {pipeline_mode = #tpu.pipeline_mode<synchronous>, transform_indices = @transform_1, window_bounds = array<i64: 128, 128>}, {transform_indices = @transform_2, window_bounds = array<i64: 32, 128>}, {pipeline_mode = #tpu.pipeline_mode<synchronous>, transform_indices = @transform_3, window_bounds = array<i64: 1, 128>}, {pipeline_mode = #tpu.pipeline_mode<synchronous>, transform_indices = @transform_4, window_bounds = array<i64: 1, 128>}]} {
    %c0 = arith.constant 0 : index
    %c0_0 = arith.constant 0 : index
    %0 = vector.load %arg1[%c0, %c0_0] : memref<32x128xbf16, #tpu.memory_space<vmem>>, vector<32x128xbf16>
    %c0_1 = arith.constant 0 : index
    %c0_2 = arith.constant 0 : index
    %1 = vector.load %arg2[%c0_1, %c0_2] : memref<128x128xbf16, #tpu.memory_space<vmem>>, vector<128x128xbf16>
    %cst = arith.constant dense<0.000000e+00> : vector<32x128xf32>
    %2 = tpu.matmul %0, %1, %cst {dimension_numbers = #tpu.dot_dimension_numbers<[1], [0], [0], [1], [0, 0, 1, 1], [], []>} : vector<32x128xbf16>, vector<128x128xbf16>, vector<32x128xf32> -> vector<32x128xf32>
    %c0_i32 = arith.constant 0 : i32
    %3 = arith.cmpi eq, %arg0, %c0_i32 : i32
    %4 = arith.extui %3 : i1 to i32
    %c0_i32_3 = arith.constant 0 : i32
    %5 = arith.cmpi ne, %4, %c0_i32_3 : i32
    scf.if %5 {
      %cst_16 = arith.constant 0.000000e+00 : f32
      %19 = vector.broadcast %cst_16 : f32 to vector<1x128xf32>
      %c0_17 = arith.constant 0 : index
      %c0_18 = arith.constant 0 : index
      %20 = vector.load %arg4[%c0_17, %c0_18] : memref<1x128xf32, #tpu.memory_space<vmem>>, vector<1x128xf32>
      tpu.vector_store %arg4[%c0_17, %c0_18], %19 {strides = array<i32>} : memref<1x128xf32, #tpu.memory_space<vmem>>, vector<1x128xf32>,
      %cst_19 = arith.constant 0.000000e+00 : f32
      %21 = vector.broadcast %cst_19 : f32 to vector<1x128xf32>
      %c0_20 = arith.constant 0 : index
      %c0_21 = arith.constant 0 : index
      %22 = vector.load %arg5[%c0_20, %c0_21] : memref<1x128xf32, #tpu.memory_space<vmem>>, vector<1x128xf32>
      tpu.vector_store %arg5[%c0_20, %c0_21], %21 {strides = array<i32>} : memref<1x128xf32, #tpu.memory_space<vmem>>, vector<1x128xf32>,
    } else {
    }
    %c0_4 = arith.constant 0 : index
    %c0_5 = arith.constant 0 : index
    %6 = vector.load %arg4[%c0_4, %c0_5] : memref<1x128xf32, #tpu.memory_space<vmem>>, vector<1x128xf32>
    %cst_6 = arith.constant dense<0.000000e+00> : vector<128xf32>
    %7 = vector.multi_reduction <add>, %2, %cst_6 [0] : vector<32x128xf32> to vector<128xf32>
    %8 = vector.shape_cast %7 : vector<128xf32> to vector<1x128xf32>
    %9 = arith.addf %6, %8 : vector<1x128xf32>
    %c0_7 = arith.constant 0 : index
    %c0_8 = arith.constant 0 : index
    %10 = vector.load %arg4[%c0_7, %c0_8] : memref<1x128xf32, #tpu.memory_space<vmem>>, vector<1x128xf32>
    tpu.vector_store %arg4[%c0_7, %c0_8], %9 {strides = array<i32>} : memref<1x128xf32, #tpu.memory_space<vmem>>, vector<1x128xf32>,
    %c0_9 = arith.constant 0 : index
    %c0_10 = arith.constant 0 : index
    %11 = vector.load %arg5[%c0_9, %c0_10] : memref<1x128xf32, #tpu.memory_space<vmem>>, vector<1x128xf32>
    %12 = arith.mulf %2, %2 : vector<32x128xf32>
    %cst_11 = arith.constant dense<0.000000e+00> : vector<128xf32>
    %13 = vector.multi_reduction <add>, %12, %cst_11 [0] : vector<32x128xf32> to vector<128xf32>
    %14 = vector.shape_cast %13 : vector<128xf32> to vector<1x128xf32>
    %15 = arith.addf %11, %14 : vector<1x128xf32>
    %c0_12 = arith.constant 0 : index
    %c0_13 = arith.constant 0 : index
    %16 = vector.load %arg5[%c0_12, %c0_13] : memref<1x128xf32, #tpu.memory_space<vmem>>, vector<1x128xf32>
    tpu.vector_store %arg5[%c0_12, %c0_13], %15 {strides = array<i32>} : memref<1x128xf32, #tpu.memory_space<vmem>>, vector<1x128xf32>,
    %17 = arith.truncf %2 : vector<32x128xf32> to vector<32x128xbf16>
    %c0_14 = arith.constant 0 : index
    %c0_15 = arith.constant 0 : index
    %18 = vector.load %arg3[%c0_14, %c0_15] : memref<32x128xbf16, #tpu.memory_space<vmem>>, vector<32x128xbf16>
    tpu.vector_store %arg3[%c0_14, %c0_15], %17 {strides = array<i32>} : memref<32x128xbf16, #tpu.memory_space<vmem>>, vector<32x128xbf16>,
    return
  }
  func.func @transform_0(%arg0: i32) -> (i32, i32) {
    %c0_i32 = arith.constant 0 : i32
    %c0_i32_0 = arith.constant 0 : i32
    return %arg0, %c0_i32 : i32, i32
  }
  func.func @transform_1(%arg0: i32) -> (i32, i32) {
    %c0_i32 = arith.constant 0 : i32
    %c0_i32_0 = arith.constant 0 : i32
    %c0_i32_1 = arith.constant 0 : i32
    return %c0_i32, %c0_i32_0 : i32, i32
  }
  func.func @transform_2(%arg0: i32) -> (i32, i32) {
    %c0_i32 = arith.constant 0 : i32
    %c0_i32_0 = arith.constant 0 : i32
    return %arg0, %c0_i32 : i32, i32
  }
  func.func @transform_3(%arg0: i32) -> (i32, i32) {
    %c0_i32 = arith.constant 0 : i32
    %c0_i32_0 = arith.constant 0 : i32
    %c0_i32_1 = arith.constant 0 : i32
    return %c0_i32, %c0_i32_0 : i32, i32
  }
  func.func @transform_4(%arg0: i32) -> (i32, i32) {
    %c0_i32 = arith.constant 0 : i32
    %c0_i32_0 = arith.constant 0 : i32
    %c0_i32_1 = arith.constant 0 : i32
    return %c0_i32, %c0_i32_0 : i32, i32
  }
}

module attributes {stable_mosaic.version = 11 : i64} {
  func.func @_bn_relu_kernel(%arg0: i32, %arg1: memref<32x128xbf16, #tpu.memory_space<vmem>>, %arg2: memref<1x128xf32, #tpu.memory_space<vmem>>, %arg3: memref<1x128xf32, #tpu.memory_space<vmem>>, %arg4: memref<32x128xbf16, #tpu.memory_space<vmem>>) attributes {dimension_semantics = [#tpu.dimension_semantics<parallel>], iteration_bounds = array<i64: 1>, scalar_prefetch = 0 : i64, scratch_operands = 0 : i64, tpu.core_type = #tpu.core_type<tc>, window_params = [{transform_indices = @transform_0, window_bounds = array<i64: 32, 128>}, {pipeline_mode = #tpu.pipeline_mode<synchronous>, transform_indices = @transform_1, window_bounds = array<i64: 1, 128>}, {pipeline_mode = #tpu.pipeline_mode<synchronous>, transform_indices = @transform_2, window_bounds = array<i64: 1, 128>}, {transform_indices = @transform_3, window_bounds = array<i64: 32, 128>}]} {
    %c0 = arith.constant 0 : index
    %c0_0 = arith.constant 0 : index
    %0 = vector.load %arg1[%c0, %c0_0] : memref<32x128xbf16, #tpu.memory_space<vmem>>, vector<32x128xbf16>
    %1 = arith.extf %0 : vector<32x128xbf16> to vector<32x128xf32>
    %c0_1 = arith.constant 0 : index
    %c0_2 = arith.constant 0 : index
    %2 = vector.load %arg2[%c0_1, %c0_2] : memref<1x128xf32, #tpu.memory_space<vmem>>, vector<1x128xf32>
    %3 = vector.broadcast %2 : vector<1x128xf32> to vector<32x128xf32>
    %4 = arith.mulf %1, %3 : vector<32x128xf32>
    %c0_3 = arith.constant 0 : index
    %c0_4 = arith.constant 0 : index
    %5 = vector.load %arg3[%c0_3, %c0_4] : memref<1x128xf32, #tpu.memory_space<vmem>>, vector<1x128xf32>
    %6 = vector.broadcast %5 : vector<1x128xf32> to vector<32x128xf32>
    %7 = arith.addf %4, %6 : vector<32x128xf32>
    %cst = arith.constant 0.000000e+00 : f32
    %8 = vector.broadcast %cst : f32 to vector<32x128xf32>
    %9 = arith.maximumf %7, %8 : vector<32x128xf32>
    %10 = arith.truncf %9 : vector<32x128xf32> to vector<32x128xbf16>
    %c0_5 = arith.constant 0 : index
    %c0_6 = arith.constant 0 : index
    %11 = vector.load %arg4[%c0_5, %c0_6] : memref<32x128xbf16, #tpu.memory_space<vmem>>, vector<32x128xbf16>
    tpu.vector_store %arg4[%c0_5, %c0_6], %10 {strides = array<i32>} : memref<32x128xbf16, #tpu.memory_space<vmem>>, vector<32x128xbf16>,
    return
  }
  func.func @transform_0(%arg0: i32) -> (i32, i32) {
    %c0_i32 = arith.constant 0 : i32
    %c0_i32_0 = arith.constant 0 : i32
    return %arg0, %c0_i32 : i32, i32
  }
  func.func @transform_1(%arg0: i32) -> (i32, i32) {
    %c0_i32 = arith.constant 0 : i32
    %c0_i32_0 = arith.constant 0 : i32
    %c0_i32_1 = arith.constant 0 : i32
    return %c0_i32, %c0_i32_0 : i32, i32
  }
  func.func @transform_2(%arg0: i32) -> (i32, i32) {
    %c0_i32 = arith.constant 0 : i32
    %c0_i32_0 = arith.constant 0 : i32
    %c0_i32_1 = arith.constant 0 : i32
    return %c0_i32, %c0_i32_0 : i32, i32
  }
  func.func @transform_3(%arg0: i32) -> (i32, i32) {
    %c0_i32 = arith.constant 0 : i32
    %c0_i32_0 = arith.constant 0 : i32
    return %arg0, %c0_i32 : i32, i32
  }
}

module attributes {stable_mosaic.version = 11 : i64} {
  func.func @_gemm_bn_stats_kernel(%arg0: i32, %arg1: memref<32x512xbf16, #tpu.memory_space<vmem>>, %arg2: memref<512x512xbf16, #tpu.memory_space<vmem>>, %arg3: memref<32x512xbf16, #tpu.memory_space<vmem>>, %arg4: memref<1x512xf32, #tpu.memory_space<vmem>>, %arg5: memref<1x512xf32, #tpu.memory_space<vmem>>) attributes {dimension_semantics = [#tpu.dimension_semantics<arbitrary>], iteration_bounds = array<i64: 1>, scalar_prefetch = 0 : i64, scratch_operands = 0 : i64, tpu.core_type = #tpu.core_type<tc>, window_params = [{transform_indices = @transform_0, window_bounds = array<i64: 32, 512>}, {pipeline_mode = #tpu.pipeline_mode<synchronous>, transform_indices = @transform_1, window_bounds = array<i64: 512, 512>}, {transform_indices = @transform_2, window_bounds = array<i64: 32, 512>}, {pipeline_mode = #tpu.pipeline_mode<synchronous>, transform_indices = @transform_3, window_bounds = array<i64: 1, 512>}, {pipeline_mode = #tpu.pipeline_mode<synchronous>, transform_indices = @transform_4, window_bounds = array<i64: 1, 512>}]} {
    %c0 = arith.constant 0 : index
    %c0_0 = arith.constant 0 : index
    %0 = vector.load %arg1[%c0, %c0_0] : memref<32x512xbf16, #tpu.memory_space<vmem>>, vector<32x512xbf16>
    %c0_1 = arith.constant 0 : index
    %c0_2 = arith.constant 0 : index
    %1 = vector.load %arg2[%c0_1, %c0_2] : memref<512x512xbf16, #tpu.memory_space<vmem>>, vector<512x512xbf16>
    %cst = arith.constant dense<0.000000e+00> : vector<32x512xf32>
    %2 = tpu.matmul %0, %1, %cst {dimension_numbers = #tpu.dot_dimension_numbers<[1], [0], [0], [1], [0, 0, 1, 1], [], []>} : vector<32x512xbf16>, vector<512x512xbf16>, vector<32x512xf32> -> vector<32x512xf32>
    %c0_i32 = arith.constant 0 : i32
    %3 = arith.cmpi eq, %arg0, %c0_i32 : i32
    %4 = arith.extui %3 : i1 to i32
    %c0_i32_3 = arith.constant 0 : i32
    %5 = arith.cmpi ne, %4, %c0_i32_3 : i32
    scf.if %5 {
      %cst_16 = arith.constant 0.000000e+00 : f32
      %19 = vector.broadcast %cst_16 : f32 to vector<1x512xf32>
      %c0_17 = arith.constant 0 : index
      %c0_18 = arith.constant 0 : index
      %20 = vector.load %arg4[%c0_17, %c0_18] : memref<1x512xf32, #tpu.memory_space<vmem>>, vector<1x512xf32>
      tpu.vector_store %arg4[%c0_17, %c0_18], %19 {strides = array<i32>} : memref<1x512xf32, #tpu.memory_space<vmem>>, vector<1x512xf32>,
      %cst_19 = arith.constant 0.000000e+00 : f32
      %21 = vector.broadcast %cst_19 : f32 to vector<1x512xf32>
      %c0_20 = arith.constant 0 : index
      %c0_21 = arith.constant 0 : index
      %22 = vector.load %arg5[%c0_20, %c0_21] : memref<1x512xf32, #tpu.memory_space<vmem>>, vector<1x512xf32>
      tpu.vector_store %arg5[%c0_20, %c0_21], %21 {strides = array<i32>} : memref<1x512xf32, #tpu.memory_space<vmem>>, vector<1x512xf32>,
    } else {
    }
    %c0_4 = arith.constant 0 : index
    %c0_5 = arith.constant 0 : index
    %6 = vector.load %arg4[%c0_4, %c0_5] : memref<1x512xf32, #tpu.memory_space<vmem>>, vector<1x512xf32>
    %cst_6 = arith.constant dense<0.000000e+00> : vector<512xf32>
    %7 = vector.multi_reduction <add>, %2, %cst_6 [0] : vector<32x512xf32> to vector<512xf32>
    %8 = vector.shape_cast %7 : vector<512xf32> to vector<1x512xf32>
    %9 = arith.addf %6, %8 : vector<1x512xf32>
    %c0_7 = arith.constant 0 : index
    %c0_8 = arith.constant 0 : index
    %10 = vector.load %arg4[%c0_7, %c0_8] : memref<1x512xf32, #tpu.memory_space<vmem>>, vector<1x512xf32>
    tpu.vector_store %arg4[%c0_7, %c0_8], %9 {strides = array<i32>} : memref<1x512xf32, #tpu.memory_space<vmem>>, vector<1x512xf32>,
    %c0_9 = arith.constant 0 : index
    %c0_10 = arith.constant 0 : index
    %11 = vector.load %arg5[%c0_9, %c0_10] : memref<1x512xf32, #tpu.memory_space<vmem>>, vector<1x512xf32>
    %12 = arith.mulf %2, %2 : vector<32x512xf32>
    %cst_11 = arith.constant dense<0.000000e+00> : vector<512xf32>
    %13 = vector.multi_reduction <add>, %12, %cst_11 [0] : vector<32x512xf32> to vector<512xf32>
    %14 = vector.shape_cast %13 : vector<512xf32> to vector<1x512xf32>
    %15 = arith.addf %11, %14 : vector<1x512xf32>
    %c0_12 = arith.constant 0 : index
    %c0_13 = arith.constant 0 : index
    %16 = vector.load %arg5[%c0_12, %c0_13] : memref<1x512xf32, #tpu.memory_space<vmem>>, vector<1x512xf32>
    tpu.vector_store %arg5[%c0_12, %c0_13], %15 {strides = array<i32>} : memref<1x512xf32, #tpu.memory_space<vmem>>, vector<1x512xf32>,
    %17 = arith.truncf %2 : vector<32x512xf32> to vector<32x512xbf16>
    %c0_14 = arith.constant 0 : index
    %c0_15 = arith.constant 0 : index
    %18 = vector.load %arg3[%c0_14, %c0_15] : memref<32x512xbf16, #tpu.memory_space<vmem>>, vector<32x512xbf16>
    tpu.vector_store %arg3[%c0_14, %c0_15], %17 {strides = array<i32>} : memref<32x512xbf16, #tpu.memory_space<vmem>>, vector<32x512xbf16>,
    return
  }
  func.func @transform_0(%arg0: i32) -> (i32, i32) {
    %c0_i32 = arith.constant 0 : i32
    %c0_i32_0 = arith.constant 0 : i32
    return %arg0, %c0_i32 : i32, i32
  }
  func.func @transform_1(%arg0: i32) -> (i32, i32) {
    %c0_i32 = arith.constant 0 : i32
    %c0_i32_0 = arith.constant 0 : i32
    %c0_i32_1 = arith.constant 0 : i32
    return %c0_i32, %c0_i32_0 : i32, i32
  }
  func.func @transform_2(%arg0: i32) -> (i32, i32) {
    %c0_i32 = arith.constant 0 : i32
    %c0_i32_0 = arith.constant 0 : i32
    return %arg0, %c0_i32 : i32, i32
  }
  func.func @transform_3(%arg0: i32) -> (i32, i32) {
    %c0_i32 = arith.constant 0 : i32
    %c0_i32_0 = arith.constant 0 : i32
    %c0_i32_1 = arith.constant 0 : i32
    return %c0_i32, %c0_i32_0 : i32, i32
  }
  func.func @transform_4(%arg0: i32) -> (i32, i32) {
    %c0_i32 = arith.constant 0 : i32
    %c0_i32_0 = arith.constant 0 : i32
    %c0_i32_1 = arith.constant 0 : i32
    return %c0_i32, %c0_i32_0 : i32, i32
  }
}

module attributes {stable_mosaic.version = 11 : i64} {
  func.func @_bn_relu_kernel(%arg0: i32, %arg1: memref<32x512xbf16, #tpu.memory_space<vmem>>, %arg2: memref<1x512xf32, #tpu.memory_space<vmem>>, %arg3: memref<1x512xf32, #tpu.memory_space<vmem>>, %arg4: memref<32x512xbf16, #tpu.memory_space<vmem>>) attributes {dimension_semantics = [#tpu.dimension_semantics<parallel>], iteration_bounds = array<i64: 1>, scalar_prefetch = 0 : i64, scratch_operands = 0 : i64, tpu.core_type = #tpu.core_type<tc>, window_params = [{transform_indices = @transform_0, window_bounds = array<i64: 32, 512>}, {pipeline_mode = #tpu.pipeline_mode<synchronous>, transform_indices = @transform_1, window_bounds = array<i64: 1, 512>}, {pipeline_mode = #tpu.pipeline_mode<synchronous>, transform_indices = @transform_2, window_bounds = array<i64: 1, 512>}, {transform_indices = @transform_3, window_bounds = array<i64: 32, 512>}]} {
    %c0 = arith.constant 0 : index
    %c0_0 = arith.constant 0 : index
    %0 = vector.load %arg1[%c0, %c0_0] : memref<32x512xbf16, #tpu.memory_space<vmem>>, vector<32x512xbf16>
    %1 = arith.extf %0 : vector<32x512xbf16> to vector<32x512xf32>
    %c0_1 = arith.constant 0 : index
    %c0_2 = arith.constant 0 : index
    %2 = vector.load %arg2[%c0_1, %c0_2] : memref<1x512xf32, #tpu.memory_space<vmem>>, vector<1x512xf32>
    %3 = vector.broadcast %2 : vector<1x512xf32> to vector<32x512xf32>
    %4 = arith.mulf %1, %3 : vector<32x512xf32>
    %c0_3 = arith.constant 0 : index
    %c0_4 = arith.constant 0 : index
    %5 = vector.load %arg3[%c0_3, %c0_4] : memref<1x512xf32, #tpu.memory_space<vmem>>, vector<1x512xf32>
    %6 = vector.broadcast %5 : vector<1x512xf32> to vector<32x512xf32>
    %7 = arith.addf %4, %6 : vector<32x512xf32>
    %cst = arith.constant 0.000000e+00 : f32
    %8 = vector.broadcast %cst : f32 to vector<32x512xf32>
    %9 = arith.maximumf %7, %8 : vector<32x512xf32>
    %10 = arith.truncf %9 : vector<32x512xf32> to vector<32x512xbf16>
    %c0_5 = arith.constant 0 : index
    %c0_6 = arith.constant 0 : index
    %11 = vector.load %arg4[%c0_5, %c0_6] : memref<32x512xbf16, #tpu.memory_space<vmem>>, vector<32x512xbf16>
    tpu.vector_store %arg4[%c0_5, %c0_6], %10 {strides = array<i32>} : memref<32x512xbf16, #tpu.memory_space<vmem>>, vector<32x512xbf16>,
    return
  }
  func.func @transform_0(%arg0: i32) -> (i32, i32) {
    %c0_i32 = arith.constant 0 : i32
    %c0_i32_0 = arith.constant 0 : i32
    return %arg0, %c0_i32 : i32, i32
  }
  func.func @transform_1(%arg0: i32) -> (i32, i32) {
    %c0_i32 = arith.constant 0 : i32
    %c0_i32_0 = arith.constant 0 : i32
    %c0_i32_1 = arith.constant 0 : i32
    return %c0_i32, %c0_i32_0 : i32, i32
  }
  func.func @transform_2(%arg0: i32) -> (i32, i32) {
    %c0_i32 = arith.constant 0 : i32
    %c0_i32_0 = arith.constant 0 : i32
    %c0_i32_1 = arith.constant 0 : i32
    return %c0_i32, %c0_i32_0 : i32, i32
  }
  func.func @transform_3(%arg0: i32) -> (i32, i32) {
    %c0_i32 = arith.constant 0 : i32
    %c0_i32_0 = arith.constant 0 : i32
    return %arg0, %c0_i32 : i32, i32
  }
}

module attributes {stable_mosaic.version = 11 : i64} {
  func.func @_gemm_act_kernel(%arg0: i32, %arg1: memref<128x512xbf16, #tpu.memory_space<vmem>>, %arg2: memref<512x512xbf16, #tpu.memory_space<vmem>>, %arg3: memref<128x512xf32, #tpu.memory_space<vmem>>) attributes {dimension_semantics = [#tpu.dimension_semantics<parallel>], iteration_bounds = array<i64: 1>, scalar_prefetch = 0 : i64, scratch_operands = 0 : i64, tpu.core_type = #tpu.core_type<tc>, window_params = [{transform_indices = @transform_0, window_bounds = array<i64: 128, 512>}, {pipeline_mode = #tpu.pipeline_mode<synchronous>, transform_indices = @transform_1, window_bounds = array<i64: 512, 512>}, {transform_indices = @transform_2, window_bounds = array<i64: 128, 512>}]} {
    %c0 = arith.constant 0 : index
    %c0_0 = arith.constant 0 : index
    %0 = vector.load %arg1[%c0, %c0_0] : memref<128x512xbf16, #tpu.memory_space<vmem>>, vector<128x512xbf16>
    %c0_1 = arith.constant 0 : index
    %c0_2 = arith.constant 0 : index
    %1 = vector.load %arg2[%c0_1, %c0_2] : memref<512x512xbf16, #tpu.memory_space<vmem>>, vector<512x512xbf16>
    %cst = arith.constant dense<0.000000e+00> : vector<128x512xf32>
    %2 = tpu.matmul %0, %1, %cst {dimension_numbers = #tpu.dot_dimension_numbers<[1], [0], [0], [1], [0, 0, 1, 1], [], []>} : vector<128x512xbf16>, vector<512x512xbf16>, vector<128x512xf32> -> vector<128x512xf32>
    %3 = math.tanh %2 : vector<128x512xf32>
    %c0_3 = arith.constant 0 : index
    %c0_4 = arith.constant 0 : index
    %4 = vector.load %arg3[%c0_3, %c0_4] : memref<128x512xf32, #tpu.memory_space<vmem>>, vector<128x512xf32>
    tpu.vector_store %arg3[%c0_3, %c0_4], %3 {strides = array<i32>} : memref<128x512xf32, #tpu.memory_space<vmem>>, vector<128x512xf32>,
    return
  }
  func.func @transform_0(%arg0: i32) -> (i32, i32) {
    %c0_i32 = arith.constant 0 : i32
    %c0_i32_0 = arith.constant 0 : i32
    return %arg0, %c0_i32 : i32, i32
  }
  func.func @transform_1(%arg0: i32) -> (i32, i32) {
    %c0_i32 = arith.constant 0 : i32
    %c0_i32_0 = arith.constant 0 : i32
    %c0_i32_1 = arith.constant 0 : i32
    return %c0_i32, %c0_i32_0 : i32, i32
  }
  func.func @transform_2(%arg0: i32) -> (i32, i32) {
    %c0_i32 = arith.constant 0 : i32
    %c0_i32_0 = arith.constant 0 : i32
    return %arg0, %c0_i32 : i32, i32
  }
}

</mosaic_0001>

<bundles_post_ra>
// kernel: _lambda_.6
= control target key start
LH: loop header
LB: loop body
LE: loop exit
PB: predicated region body
PF: predicated region fallthrough
CT: control target
= control target key end

     0   :  { %s140_s0 = inlined_call_operand.vmem [shape: bf16[32,128], index: 0, kind: input, shape index: {}]   ;;  %s141_s1 = inlined_call_operand.vmem [shape: f32[1,128], index: 1, kind: input, shape index: {}]   ;;  %s142_s2 = inlined_call_operand.vmem [shape: f32[1,128], index: 2, kind: input, shape index: {}]   ;;  %s143_s3 = inlined_call_operand.vmem [shape: bf16[32,128], index: 3, kind: output, shape index: {}]  }
   0x1   :  { %v83_v0 = vld [vmem:[%s140_s0] sm:$0xff]   ;;  %v100_v4 = vld [vmem:[%s140_s0 + $0x8] sm:$0xff]  }
   0x2   :  { %v72_v1 = vld [vmem:[%s141_s1] ss:$0 sm:$0xff]  ;;  %v84_v2 = vunpack.c.l.bf16 %v83_v0  ;;  %v85_v3 = vunpack.c.h.bf16 %v83_v0  ;;  %v88_v6 = vunpack.c.l.bf16 %v100_v4  ;;  %v89_v7 = vunpack.c.h.bf16 %v100_v4 }
   0x3   :  { %v73_v5 = vld [vmem:[%s142_s2] ss:$0 sm:$0xff] }
   0x4   :  { %v29_v8 = vmul.f32 %v84_v2, %v72_v1  ;;  %v30_v9 = vmul.f32 %v85_v3, %v72_v1  ;;  %v31_v10 = vmul.f32 %v88_v6, %v72_v1  ;;  %v32_v11 = vmul.f32 %v89_v7, %v72_v1 }
   0x6   :  { %v40_v12 = vadd.f32 %v73_v5, %v29_v8  ;;  %v41_v13 = vadd.f32 %v73_v5, %v30_v9  ;;  %v42_v14 = vadd.f32 %v73_v5, %v31_v10  ;;  %v43_v15 = vadd.f32 %v73_v5, %v32_v11 }
   0x8   :  { %v44_v16 = vmax.f32 %v40_v12, 0.0  ;;  %v45_v17 = vmax.f32 %v41_v13, 0.0  ;;  %v46_v18 = vmax.f32 %v42_v14, 0.0  ;;  %v47_v19 = vmax.f32 %v43_v15, 0.0 }
   0xa   :  { %v93_v20 = vpack.c.bf16 %v45_v17, %v44_v16  ;;  %v98_v21 = vpack.c.bf16 %v47_v19, %v46_v18 }
   0xc   :  { %94 = vst [vmem:[%s143_s3] sm:$0xff] %v93_v20   ;;  %101 = vst [vmem:[%s143_s3 + $0x8] sm:$0xff] %v98_v21  }

// kernel: _lambda_.5
= control target key start
LH: loop header
LB: loop body
LE: loop exit
PB: predicated region body
PF: predicated region fallthrough
CT: control target
= control target key end

     0   :  { %10 = vsyncpa [#allocation3], 0  ;;  %s320_s15 = smov [#allocation2]   ;;  %s382_s0 = inlined_call_operand.vmem [shape: bf16[32,128], index: 0, kind: input, shape index: {}]   ;;  %s383_s1 = inlined_call_operand.hbm [shape: bf16[128,128], index: 1, kind: input, shape index: {}]   ;;  %s384_s2 = inlined_call_operand.vmem [shape: bf16[32,128], index: 2, kind: output, shape index: {0}]   ;;  %s385_s3 = inlined_call_operand.vmem [shape: f32[1,128], index: 3, kind: output, shape index: {1}]   ;;  %s386_s4 = inlined_call_operand.vmem [shape: f32[1,128], index: 4, kind: output, shape index: {2}]  }
   0x1   :  { %s18_s16 = sshll.u32 %s320_s15, 4  ;;  %s19_s16 = int_to_ptr.vmem [resolvable:$true] %s18_s16 }
   0x2   :  { %s306_s17 = scalar_lea.vmem %s19_s16, 1024  ;;  %p311_p1 = scmp.lt.s32.totalorder %s19_s16, %s19_s16 }
   0x3   :  { %p307_p0 = scmp.ne.s32.totalorder %s19_s16, %s306_s17  ;;  %p312_p2 = scmp.lt.s32.totalorder %s306_s17, %s306_s17 }
   0x5   :  { %p313_p3 = por %p312_p2, %p311_p1 }
   0x7   :  { %p314_p4 = pnand %p313_p3, %p307_p0 }
   0x9   :  { %317 = shalt.err (!%p314_p4)
}
   0xa   :  { %s321_s18 = smov 64   ;;  %s322_s19 = smov 4  }
   0xb   :  { %24 = dma.hbm_to_vmem [thread:$0]  %s383_s1, 1024, %s19_s16, [#allocation3], %s321_s18, %s321_s18, %s322_s19  }
   0xc   :  { %318 = dma.done.wait [#allocation3], 1024  }
   0xd   :  { %319 = vsyncadd [#allocation3], 4294966272  ;;  %v288_v0 = vld [vmem:[#allocation2 + $0x38] sm:$0xff]   ;;  %v289_v1 = vld [vmem:[#allocation2 + $0x30] sm:$0xff]   ;;  %v323_v10 = vmov 0.0  }
   0xe   :  { %264 = vmatprep.subr.bf16.mxu0 %v288_v0  ;;  %v290_v2 = vld [vmem:[#allocation2 + $0x28] sm:$0xff]   ;;  %v291_v3 = vld [vmem:[#allocation2 + $0x20] sm:$0xff]   ;;  %v292_v5 = vld [vmem:[#allocation2 + $0x18] sm:$0xff]   ;;  %162 = vst [vmem:[%s385_s3] sm:$0x1] %v323_v10 }
   0xf   :  { %265 = vmatpush3.bf16.msra.mxu0 %v288_v0  ;;  %v296_v4 = vld [vmem:[%s382_s0] sm:$0xff]   ;;  %v293_v6 = vld [vmem:[#allocation2 + $0x10] sm:$0xff]   ;;  %v294_v7 = vld [vmem:[#allocation2 + $0x8] sm:$0xff]   ;;  %163 = vst [vmem:[%s386_s4] sm:$0x1] %v323_v10 }
  0x10   :  { %266 = vmatprep.subr.bf16.mxu0 %v289_v1  ;;  %280 = vmatprep.mubr.bf16.mxu0 %v296_v4  ;;  %v295_v8 = vld [vmem:[#allocation2] sm:$0xff]   ;;  %v297_v9 = vld [vmem:[%s382_s0 + $0x8] sm:$0xff]  }
  0x13   :  { %267 = vmatpush3.bf16.msra.mxu0 %v289_v1 }
  0x14   :  { %268 = vmatprep.subr.bf16.mxu0 %v290_v2 }
  0x15   :  { %v164_v36 = vld [vmem:[%s385_s3] sm:$0x1] }
  0x16   :  { %v176_v39 = vld [vmem:[%s386_s4] sm:$0x1] }
  0x17   :  { %269 = vmatpush3.bf16.msra.mxu0 %v290_v2 }
  0x18   :  { %270 = vmatprep.subr.bf16.mxu0 %v291_v3 }
  0x1b   :  { %271 = vmatpush3.bf16.msra.mxu0 %v291_v3 }
  0x1c   :  { %272 = vmatprep.subr.bf16.mxu0 %v292_v5 }
  0x1f   :  { %273 = vmatpush3.bf16.msra.mxu0 %v292_v5 }
  0x20   :  { %274 = vmatprep.subr.bf16.mxu0 %v293_v6 }
  0x23   :  { %275 = vmatpush3.bf16.msra.mxu0 %v293_v6 }
  0x24   :  { %276 = vmatprep.subr.bf16.mxu0 %v294_v7 }
  0x27   :  { %277 = vmatpush3.bf16.msra.mxu0 %v294_v7 }
  0x28   :  { %278 = vmatprep.subr.bf16.mxu0 %v295_v8 }
  0x2b   :  { %279 = vmatpush3.bf16.msra.mxu0 %v295_v8 }
  0x2e   :  { %281 = vmatmul.mubr.bf16.vlgmr.msra.gmra.mxu0 %v297_v9 }
  0xee   :  { %v282_v11 = vpop.f32.mrf.mxu0 }
  0xef   :  { %v179_v20 = vmul.f32 %v282_v11, %v282_v11 }
  0xf0   :  { %v143_v12 = vpop.f32.mrf.mxu0 }
  0xf1   :  { %v177_v16 = vmul.f32 %v143_v12, %v143_v12 }
  0xf2   :  { %v283_v13 = vpop.f32.mrf.mxu0 }
  0xf3   :  { %v251_v14 = vpack.c.bf16 %v283_v13, %v282_v11  ;;  %v180_v23 = vmul.f32 %v283_v13, %v283_v13 }
  0xf4   :  { %v146_v15 = vpop.f32.mrf.mxu0 }
  0xf5   :  { %253 = vst [vmem:[%s384_s2 + $0x8] sm:$0xff] %v251_v14   ;;  %v165_v17 = vadd.f32 %v146_v15, %v143_v12  ;;  %v178_v18 = vmul.f32 %v146_v15, %v146_v15  ;;  %v246_v19 = vpack.c.bf16 %v146_v15, %v143_v12 }
  0xf7   :  { %v166_v21 = vadd.f32 %v282_v11, %v165_v17  ;;  %v181_v22 = vadd.f32 %v178_v18, %v177_v16  ;;  %247 = vst [vmem:[%s384_s2] sm:$0xff] %v246_v19  }
  0xf9   :  { %v167_v24 = vadd.f32 %v283_v13, %v166_v21  ;;  %v182_v25 = vadd.f32 %v181_v22, %v179_v20 }
  0xfb   :  { %v168_v26 = vrot.slane %v167_v24, 4  ;;  %v183_v27 = vadd.f32 %v182_v25, %v180_v23 }
  0xfd   :  { %v169_v28 = vadd.f32 %v168_v26, %v167_v24  ;;  %v184_v29 = vrot.slane %v183_v27, 4 }
  0xff   :  { %v170_v30 = vrot.slane %v169_v28, 2  ;;  %v185_v31 = vadd.f32 %v184_v29, %v183_v27 }
 0x101   :  { %v171_v32 = vadd.f32 %v170_v30, %v169_v28  ;;  %v186_v33 = vrot.slane %v185_v31, 2 }
 0x103   :  { %v172_v34 = vrot.slane %v171_v32, 1  ;;  %v187_v35 = vadd.f32 %v186_v33, %v185_v31 }
 0x105   :  { %v173_v37 = vadd.f32 %v172_v34, %v171_v32  ;;  %v188_v38 = vrot.slane %v187_v35, 1 }
 0x107   :  { %v174_v40 = vadd.f32 %v173_v37, %v164_v36  ;;  %v189_v41 = vadd.f32 %v188_v38, %v187_v35 }
 0x109   :  { %175 = vst [vmem:[%s385_s3] sm:$0x1] %v174_v40  ;;  %v190_v42 = vadd.f32 %v189_v41, %v176_v39 }
 0x10b   :  { %191 = vst [vmem:[%s386_s4] sm:$0x1] %v190_v42 }
 0x10c   :  { %224 = vsyncpa [#allocation3], 1 }

// kernel: _lambda_.8
= control target key start
LH: loop header
LB: loop body
LE: loop exit
PB: predicated region body
PF: predicated region fallthrough
CT: control target
= control target key end

     0   :  { %v40_v0 = vlaneseq  ;;  %s304_s0 = inlined_call_operand.vmem [shape: bf16[32,512], index: 0, kind: input, shape index: {}]   ;;  %s305_s1 = inlined_call_operand.vmem [shape: f32[1,512], index: 1, kind: input, shape index: {}]   ;;  %s306_s2 = inlined_call_operand.vmem [shape: f32[1,512], index: 2, kind: input, shape index: {}]   ;;  %s307_s3 = inlined_call_operand.vmem [shape: bf16[32,512], index: 3, kind: output, shape index: {}]  }
   0x1   :  { %v14_v1 = vld [vmem:[%s304_s0] sm:$0xff]  ;;  %v15_v5 = vld [vmem:[%s304_s0 + $0x8] sm:$0xff]  ;;  %v16_v6 = vld [vmem:[%s304_s0 + $0x10] sm:$0xff] }
   0x2   :  { %v22_v2 = vunpack.c.l.bf16 %v14_v1  ;;  %v23_v3 = vunpack.c.h.bf16 %v14_v1  ;;  %v41_v4 = vshrl.u32 %v40_v0, 7  ;;  %v17_v7 = vld [vmem:[%s304_s0 + $0x18] sm:$0xff]  ;;  %v38_v8 = vld [vmem:[%s305_s1] sm:$0xf]  ;;  %v24_v10 = vunpack.c.l.bf16 %v15_v5  ;;  %v19_v51 = vld [vmem:[%s304_s0 + $0x28] sm:$0xff] }
   0x3   :  { %v76_v9 = vld [vmem:[%s306_s2] sm:$0xf]  ;;  %v25_v11 = vunpack.c.h.bf16 %v15_v5  ;;  %v26_v12 = vunpack.c.l.bf16 %v16_v6  ;;  %v27_v13 = vunpack.c.h.bf16 %v16_v6  ;;  %v28_v19 = vunpack.c.l.bf16 %v17_v7  ;;  %v20_v56 = vld [vmem:[%s304_s0 + $0x30] sm:$0xff]  ;;  %v21_v61 = vld [vmem:[%s304_s0 + $0x38] sm:$0xff] }
   0x4   :  { %v18_v14 = vld [vmem:[%s304_s0 + $0x20] sm:$0xff]  ;;  %v42_v15 = vsub.s32 0, %v41_v4  ;;  %v46_v16 = vsub.s32 1, %v41_v4  ;;  %v50_v17 = vsub.s32 2, %v41_v4  ;;  %v54_v18 = vsub.s32 3, %v41_v4 }
   0x5   :  { %v29_v20 = vunpack.c.h.bf16 %v17_v7  ;;  %v30_v21 = vunpack.c.l.bf16 %v18_v14  ;;  %v31_v22 = vunpack.c.h.bf16 %v18_v14  ;;  %v32_v0 = vunpack.c.l.bf16 %v19_v51 }
   0x6   :  { %v43_v23 = vrot.slane %v38_v8, %v42_v15  ;;  %v47_v24 = vrot.slane %v38_v8, %v46_v16  ;;  %v247_v25 = vrot.slane %v76_v9, %v42_v15  ;;  %v249_v26 = vrot.slane %v76_v9, %v46_v16 }
   0x7   :  { %v51_v27 = vrot.slane %v38_v8, %v50_v17  ;;  %v55_v28 = vrot.slane %v38_v8, %v54_v18  ;;  %v251_v29 = vrot.slane %v76_v9, %v50_v17  ;;  %v253_v30 = vrot.slane %v76_v9, %v54_v18 }
   0x8   :  { %v60_v31 = vmul.f32 %v43_v23, %v22_v2  ;;  %v61_v32 = vmul.f32 %v47_v24, %v23_v3  ;;  %v64_v33 = vmul.f32 %v43_v23, %v26_v12  ;;  %v65_v34 = vmul.f32 %v47_v24, %v27_v13 }
   0x9   :  { %v62_v35 = vmul.f32 %v51_v27, %v24_v10  ;;  %v63_v36 = vmul.f32 %v55_v28, %v25_v11  ;;  %v66_v37 = vmul.f32 %v51_v27, %v28_v19  ;;  %v67_v38 = vmul.f32 %v55_v28, %v29_v20 }
   0xa   :  { %v98_v39 = vadd.f32 %v247_v25, %v60_v31  ;;  %v99_v40 = vadd.f32 %v249_v26, %v61_v32  ;;  %v102_v41 = vadd.f32 %v247_v25, %v64_v33  ;;  %v103_v42 = vadd.f32 %v249_v26, %v65_v34 }
   0xb   :  { %v100_v43 = vadd.f32 %v251_v29, %v62_v35  ;;  %v101_v44 = vadd.f32 %v253_v30, %v63_v36  ;;  %v104_v45 = vadd.f32 %v251_v29, %v66_v37  ;;  %v105_v46 = vadd.f32 %v253_v30, %v67_v38 }
   0xc   :  { %v114_v47 = vmax.f32 %v98_v39, 0.0  ;;  %v115_v48 = vmax.f32 %v99_v40, 0.0  ;;  %v118_v49 = vmax.f32 %v102_v41, 0.0  ;;  %v119_v50 = vmax.f32 %v103_v42, 0.0 }
   0xd   :  { %v116_v52 = vmax.f32 %v100_v43, 0.0  ;;  %v117_v53 = vmax.f32 %v101_v44, 0.0  ;;  %v120_v54 = vmax.f32 %v104_v45, 0.0  ;;  %v121_v55 = vmax.f32 %v105_v46, 0.0 }
   0xe   :  { %v198_v57 = vpack.c.bf16 %v115_v48, %v114_v47  ;;  %v200_v58 = vpack.c.bf16 %v119_v50, %v118_v49  ;;  %v68_v59 = vmul.f32 %v43_v23, %v30_v21  ;;  %v69_v60 = vmul.f32 %v47_v24, %v31_v22 }
   0xf   :  { %v199_v62 = vpack.c.bf16 %v117_v53, %v116_v52  ;;  %v201_v63 = vpack.c.bf16 %v121_v55, %v120_v54  ;;  %v33_v1 = vunpack.c.h.bf16 %v19_v51  ;;  %v34_v4 = vunpack.c.l.bf16 %v20_v56 }
  0x10   :  { %178 = vst [vmem:[%s307_s3] sm:$0xff] %v198_v57  ;;  %180 = vst [vmem:[%s307_s3 + $0x10] sm:$0xff] %v200_v58  ;;  %v106_v2 = vadd.f32 %v247_v25, %v68_v59  ;;  %v107_v3 = vadd.f32 %v249_v26, %v69_v60  ;;  %v35_v5 = vunpack.c.h.bf16 %v20_v56  ;;  %v70_v6 = vmul.f32 %v51_v27, %v32_v0 }
  0x11   :  { %179 = vst [vmem:[%s307_s3 + $0x8] sm:$0xff] %v199_v62  ;;  %181 = vst [vmem:[%s307_s3 + $0x18] sm:$0xff] %v201_v63  ;;  %v71_v7 = vmul.f32 %v55_v28, %v33_v1  ;;  %v36_v8 = vunpack.c.l.bf16 %v21_v61  ;;  %v37_v9 = vunpack.c.h.bf16 %v21_v61  ;;  %v72_v12 = vmul.f32 %v43_v23, %v34_v4 }
  0x12   :  { %v122_v10 = vmax.f32 %v106_v2, 0.0  ;;  %v123_v11 = vmax.f32 %v107_v3, 0.0  ;;  %v73_v13 = vmul.f32 %v47_v24, %v35_v5  ;;  %v108_v14 = vadd.f32 %v251_v29, %v70_v6 }
  0x13   :  { %v109_v15 = vadd.f32 %v253_v30, %v71_v7  ;;  %v74_v16 = vmul.f32 %v51_v27, %v36_v8  ;;  %v75_v17 = vmul.f32 %v55_v28, %v37_v9  ;;  %v110_v19 = vadd.f32 %v247_v25, %v72_v12 }
  0x14   :  { %v202_v18 = vpack.c.bf16 %v123_v11, %v122_v10  ;;  %v111_v20 = vadd.f32 %v249_v26, %v73_v13  ;;  %v124_v21 = vmax.f32 %v108_v14, 0.0 }
  0x15   :  { %v125_v22 = vmax.f32 %v109_v15, 0.0  ;;  %v112_v31 = vadd.f32 %v251_v29, %v74_v16  ;;  %v113_v32 = vadd.f32 %v253_v30, %v75_v17  ;;  %v126_v23 = vmax.f32 %v110_v19, 0.0 }
  0x16   :  { %182 = vst [vmem:[%s307_s3 + $0x20] sm:$0xff] %v202_v18  ;;  %v127_v24 = vmax.f32 %v111_v20, 0.0 }
  0x17   :  { %v203_v33 = vpack.c.bf16 %v125_v22, %v124_v21  ;;  %v128_v27 = vmax.f32 %v112_v31, 0.0  ;;  %v129_v28 = vmax.f32 %v113_v32, 0.0 }
  0x18   :  { %v204_v34 = vpack.c.bf16 %v127_v24, %v126_v23 }
  0x19   :  { %183 = vst [vmem:[%s307_s3 + $0x28] sm:$0xff] %v203_v33  ;;  %v205_v25 = vpack.c.bf16 %v129_v28, %v128_v27 }
  0x1a   :  { %184 = vst [vmem:[%s307_s3 + $0x30] sm:$0xff] %v204_v34 }
  0x1b   :  { %185 = vst [vmem:[%s307_s3 + $0x38] sm:$0xff] %v205_v25 }

// kernel: _lambda_.7
= control target key start
LH: loop header
LB: loop body
LE: loop exit
PB: predicated region body
PF: predicated region fallthrough
CT: control target
= control target key end

     0   :  { %s2171_s1 = inlined_call_operand.vmem [shape: bf16[512,512], index: 1, kind: input, shape index: {}]   ;;  %s2172_s0 = inlined_call_operand.vmem [shape: bf16[32,512], index: 0, kind: input, shape index: {}]   ;;  %s2173_s3 = inlined_call_operand.vmem [shape: f32[1,512], index: 3, kind: output, shape index: {1}]   ;;  %s2174_s4 = inlined_call_operand.vmem [shape: f32[1,512], index: 4, kind: output, shape index: {2}]   ;;  %s2175_s2 = inlined_call_operand.vmem [shape: bf16[32,512], index: 2, kind: output, shape index: {0}]  }
   0x1   :  { %v1430_v0 = vld [vmem:[%s2171_s1 + $0xe4] ss:$16 sps:$4 sm:$0xff]   ;;  %v1434_v2 = vld [vmem:[%s2171_s1 + $0xe0] ss:$16 sps:$4 sm:$0xff]   ;;  %v1819_v51 = vld [vmem:[%s2172_s0 + $0xc] ss:$16 sps:$4 sm:$0xff]  }
   0x2   :  { %v1432_v1 = vld [vmem:[%s2171_s1 + $0x2e4] ss:$16 sps:$4 sm:$0xff]   ;;  %830 = vmatprep.subr.bf16.mxu0 %v1430_v0  ;;  %v1435_v3 = vld [vmem:[%s2171_s1 + $0x2e0] ss:$16 sps:$4 sm:$0xff]   ;;  %915 = vmatprep.mubr.bf16.mxu1 %v1819_v51 }
   0x3   :  { %883 = vmatprep.subr.bf16.mxu1 %v1432_v1  ;;  %v1436_v4 = vld [vmem:[%s2171_s1 + $0xc4] ss:$16 sps:$4 sm:$0xff]   ;;  %831 = vmatpush1.bf16.msra.mxu0 %v1434_v2  ;;  %v1440_v6 = vld [vmem:[%s2171_s1 + $0xc0] ss:$16 sps:$4 sm:$0xff]   ;;  %v1534_v2 = vld [vmem:[%s2171_s1 + $0xec] ss:$16 sps:$4 sm:$0xff]  }
   0x4   :  { %884 = vmatpush1.bf16.msra.mxu1 %v1435_v3  ;;  %v1438_v5 = vld [vmem:[%s2171_s1 + $0x2c4] ss:$16 sps:$4 sm:$0xff]   ;;  %832 = vmatprep.subr.bf16.mxu0 %v1436_v4  ;;  %v1441_v7 = vld [vmem:[%s2171_s1 + $0x2c0] ss:$16 sps:$4 sm:$0xff]   ;;  %v1537_v3 = vld [vmem:[%s2171_s1 + $0x2ec] ss:$16 sps:$4 sm:$0xff]  }
   0x5   :  { %885 = vmatprep.subr.bf16.mxu1 %v1438_v5  ;;  %v1442_v8 = vld [vmem:[%s2171_s1 + $0xa4] ss:$16 sps:$4 sm:$0xff]   ;;  %v1446_v10 = vld [vmem:[%s2171_s1 + $0xa0] ss:$16 sps:$4 sm:$0xff]   ;;  %v1879_v5 = vld [vmem:[%s2172_s0 + $0x8] ss:$16 sps:$4 sm:$0xff]  }
   0x6   :  { %v1444_v9 = vld [vmem:[%s2171_s1 + $0x2a4] ss:$16 sps:$4 sm:$0xff]   ;;  %v1447_v11 = vld [vmem:[%s2171_s1 + $0x2a0] ss:$16 sps:$4 sm:$0xff]  }
   0x7   :  { %833 = vmatpush1.bf16.msra.mxu0 %v1440_v6  ;;  %v1448_v12 = vld [vmem:[%s2171_s1 + $0x84] ss:$16 sps:$4 sm:$0xff]   ;;  %v1452_v14 = vld [vmem:[%s2171_s1 + $0x80] ss:$16 sps:$4 sm:$0xff]   ;;  %v1532_v6 = vld [vmem:[%s2171_s1 + $0xe8] ss:$16 sps:$4 sm:$0xff]  }
   0x8   :  { %886 = vmatpush1.bf16.msra.mxu1 %v1441_v7  ;;  %834 = vmatprep.subr.bf16.mxu0 %v1442_v8  ;;  %v1450_v13 = vld [vmem:[%s2171_s1 + $0x284] ss:$16 sps:$4 sm:$0xff]   ;;  %v1453_v15 = vld [vmem:[%s2171_s1 + $0x280] ss:$16 sps:$4 sm:$0xff]   ;;  %v1535_v7 = vld [vmem:[%s2171_s1 + $0x2e8] ss:$16 sps:$4 sm:$0xff]  }
   0x9   :  { %887 = vmatprep.subr.bf16.mxu1 %v1444_v9  ;;  %v1454_v16 = vld [vmem:[%s2171_s1 + $0x64] ss:$16 sps:$4 sm:$0xff]   ;;  %v1458_v18 = vld [vmem:[%s2171_s1 + $0x60] ss:$16 sps:$4 sm:$0xff]   ;;  %v1540_v8 = vld [vmem:[%s2171_s1 + $0xcc] ss:$16 sps:$4 sm:$0xff]  }
   0xa   :  { %v1456_v17 = vld [vmem:[%s2171_s1 + $0x264] ss:$16 sps:$4 sm:$0xff]   ;;  %v1459_v19 = vld [vmem:[%s2171_s1 + $0x260] ss:$16 sps:$4 sm:$0xff]   ;;  %v1543_v9 = vld [vmem:[%s2171_s1 + $0x2cc] ss:$16 sps:$4 sm:$0xff]  }
   0xb   :  { %835 = vmatpush1.bf16.msra.mxu0 %v1446_v10  ;;  %v1460_v20 = vld [vmem:[%s2171_s1 + $0x44] ss:$16 sps:$4 sm:$0xff]   ;;  %v1464_v22 = vld [vmem:[%s2171_s1 + $0x40] ss:$16 sps:$4 sm:$0xff]  }
   0xc   :  { %888 = vmatpush1.bf16.msra.mxu1 %v1447_v11  ;;  %836 = vmatprep.subr.bf16.mxu0 %v1448_v12  ;;  %v1462_v21 = vld [vmem:[%s2171_s1 + $0x244] ss:$16 sps:$4 sm:$0xff]   ;;  %v1465_v23 = vld [vmem:[%s2171_s1 + $0x240] ss:$16 sps:$4 sm:$0xff]   ;;  %v1901_v11 = vld [vmem:[%s2172_s0 + $0x2c] ss:$16 sps:$4 sm:$0xff]  }
   0xd   :  { %889 = vmatprep.subr.bf16.mxu1 %v1450_v13  ;;  %v1466_v24 = vld [vmem:[%s2171_s1 + $0x24] ss:$16 sps:$4 sm:$0xff]   ;;  %v1470_v26 = vld [vmem:[%s2171_s1 + $0x20] ss:$16 sps:$4 sm:$0xff]   ;;  %v1538_v12 = vld [vmem:[%s2171_s1 + $0xc8] ss:$16 sps:$4 sm:$0xff]  }
   0xe   :  { %v1468_v25 = vld [vmem:[%s2171_s1 + $0x224] ss:$16 sps:$4 sm:$0xff]   ;;  %v1471_v27 = vld [vmem:[%s2171_s1 + $0x220] ss:$16 sps:$4 sm:$0xff]   ;;  %v1541_v13 = vld [vmem:[%s2171_s1 + $0x2c8] ss:$16 sps:$4 sm:$0xff]  }
   0xf   :  { %837 = vmatpush1.bf16.msra.mxu0 %v1452_v14  ;;  %v1472_v28 = vld [vmem:[%s2171_s1 + $0x4] ss:$16 sps:$4 sm:$0xff]   ;;  %v1476_v30 = vld [vmem:[%s2171_s1] ss:$16 sps:$4 sm:$0xff]   ;;  %v1552_v14 = vld [vmem:[%s2171_s1 + $0xac] ss:$16 sps:$4 sm:$0xff]  }
  0x10   :  { %890 = vmatpush1.bf16.msra.mxu1 %v1453_v15  ;;  %838 = vmatprep.subr.bf16.mxu0 %v1454_v16  ;;  %v1474_v29 = vld [vmem:[%s2171_s1 + $0x204] ss:$16 sps:$4 sm:$0xff]   ;;  %v1477_v31 = vld [vmem:[%s2171_s1 + $0x200] ss:$16 sps:$4 sm:$0xff]   ;;  %v1555_v15 = vld [vmem:[%s2171_s1 + $0x2ac] ss:$16 sps:$4 sm:$0xff]  }
  0x11   :  { %891 = vmatprep.subr.bf16.mxu1 %v1456_v17  ;;  %v1478_v32 = vld [vmem:[%s2171_s1 + $0x1e4] ss:$16 sps:$4 sm:$0xff]   ;;  %v1482_v34 = vld [vmem:[%s2171_s1 + $0x1e0] ss:$16 sps:$4 sm:$0xff]   ;;  %v1927_v17 = vld [vmem:[%s2172_s0 + $0x28] ss:$16 sps:$4 sm:$0xff]  }
  0x12   :  { %v1480_v33 = vld [vmem:[%s2171_s1 + $0x3e4] ss:$16 sps:$4 sm:$0xff]   ;;  %v1483_v35 = vld [vmem:[%s2171_s1 + $0x3e0] ss:$16 sps:$4 sm:$0xff]  }
  0x13   :  { %839 = vmatpush1.bf16.msra.mxu0 %v1458_v18  ;;  %v1484_v36 = vld [vmem:[%s2171_s1 + $0x1c4] ss:$16 sps:$4 sm:$0xff]   ;;  %v1488_v38 = vld [vmem:[%s2171_s1 + $0x1c0] ss:$16 sps:$4 sm:$0xff]   ;;  %v1550_v18 = vld [vmem:[%s2171_s1 + $0xa8] ss:$16 sps:$4 sm:$0xff]  }
  0x14   :  { %892 = vmatpush1.bf16.msra.mxu1 %v1459_v19  ;;  %840 = vmatprep.subr.bf16.mxu0 %v1460_v20  ;;  %v1486_v37 = vld [vmem:[%s2171_s1 + $0x3c4] ss:$16 sps:$4 sm:$0xff]   ;;  %v1489_v39 = vld [vmem:[%s2171_s1 + $0x3c0] ss:$16 sps:$4 sm:$0xff]   ;;  %v1553_v19 = vld [vmem:[%s2171_s1 + $0x2a8] ss:$16 sps:$4 sm:$0xff]  }
  0x15   :  { %893 = vmatprep.subr.bf16.mxu1 %v1462_v21  ;;  %v1490_v40 = vld [vmem:[%s2171_s1 + $0x1a4] ss:$16 sps:$4 sm:$0xff]   ;;  %v1494_v42 = vld [vmem:[%s2171_s1 + $0x1a0] ss:$16 sps:$4 sm:$0xff]   ;;  %v1558_v20 = vld [vmem:[%s2171_s1 + $0x8c] ss:$16 sps:$4 sm:$0xff]  }
  0x16   :  { %v1492_v41 = vld [vmem:[%s2171_s1 + $0x3a4] ss:$16 sps:$4 sm:$0xff]   ;;  %v1495_v43 = vld [vmem:[%s2171_s1 + $0x3a0] ss:$16 sps:$4 sm:$0xff]   ;;  %v1561_v21 = vld [vmem:[%s2171_s1 + $0x28c] ss:$16 sps:$4 sm:$0xff]  }
  0x17   :  { %841 = vmatpush1.bf16.msra.mxu0 %v1464_v22  ;;  %v1496_v44 = vld [vmem:[%s2171_s1 + $0x184] ss:$16 sps:$4 sm:$0xff]   ;;  %v1500_v46 = vld [vmem:[%s2171_s1 + $0x180] ss:$16 sps:$4 sm:$0xff]   ;;  %v1556_v22 = vld [vmem:[%s2171_s1 + $0x88] ss:$16 sps:$4 sm:$0xff]  }
  0x18   :  { %894 = vmatpush1.bf16.msra.mxu1 %v1465_v23  ;;  %842 = vmatprep.subr.bf16.mxu0 %v1466_v24  ;;  %v1498_v45 = vld [vmem:[%s2171_s1 + $0x384] ss:$16 sps:$4 sm:$0xff]   ;;  %v1501_v47 = vld [vmem:[%s2171_s1 + $0x380] ss:$16 sps:$4 sm:$0xff]   ;;  %v1559_v23 = vld [vmem:[%s2171_s1 + $0x288] ss:$16 sps:$4 sm:$0xff]  }
  0x19   :  { %895 = vmatprep.subr.bf16.mxu1 %v1468_v25  ;;  %v1502_v48 = vld [vmem:[%s2171_s1 + $0x164] ss:$16 sps:$4 sm:$0xff]   ;;  %v1506_v52 = vld [vmem:[%s2171_s1 + $0x160] ss:$16 sps:$4 sm:$0xff]   ;;  %v1564_v24 = vld [vmem:[%s2171_s1 + $0x6c] ss:$16 sps:$4 sm:$0xff]  }
  0x1a   :  { %v1811_v49 = vld [vmem:[%s2172_s0 + $0x4] ss:$16 sps:$4 sm:$0xff]   ;;  %v1507_v53 = vld [vmem:[%s2171_s1 + $0x360] ss:$16 sps:$4 sm:$0xff]   ;;  %v1567_v25 = vld [vmem:[%s2171_s1 + $0x26c] ss:$16 sps:$4 sm:$0xff]  }
  0x1b   :  { %843 = vmatpush1.bf16.msra.mxu0 %v1470_v26  ;;  %v1504_v50 = vld [vmem:[%s2171_s1 + $0x364] ss:$16 sps:$4 sm:$0xff]   ;;  %862 = vmatprep.mubr.bf16.mxu0 %v1811_v49  ;;  %v1512_v56 = vld [vmem:[%s2171_s1 + $0x140] ss:$16 sps:$4 sm:$0xff]   ;;  %v1562_v26 = vld [vmem:[%s2171_s1 + $0x68] ss:$16 sps:$4 sm:$0xff]  }
  0x1c   :  { %896 = vmatpush1.bf16.msra.mxu1 %v1471_v27  ;;  %844 = vmatprep.subr.bf16.mxu0 %v1472_v28  ;;  %v1508_v54 = vld [vmem:[%s2171_s1 + $0x144] ss:$16 sps:$4 sm:$0xff]   ;;  %v1513_v57 = vld [vmem:[%s2171_s1 + $0x340] ss:$16 sps:$4 sm:$0xff]   ;;  %v1565_v27 = vld [vmem:[%s2171_s1 + $0x268] ss:$16 sps:$4 sm:$0xff]  }
  0x1d   :  { %897 = vmatprep.subr.bf16.mxu1 %v1474_v29  ;;  %v1510_v55 = vld [vmem:[%s2171_s1 + $0x344] ss:$16 sps:$4 sm:$0xff]   ;;  %v1518_v60 = vld [vmem:[%s2171_s1 + $0x120] ss:$16 sps:$4 sm:$0xff]   ;;  %v1570_v28 = vld [vmem:[%s2171_s1 + $0x4c] ss:$16 sps:$4 sm:$0xff]  }
  0x1e   :  { %v1514_v58 = vld [vmem:[%s2171_s1 + $0x124] ss:$16 sps:$4 sm:$0xff]   ;;  %v1519_v61 = vld [vmem:[%s2171_s1 + $0x320] ss:$16 sps:$4 sm:$0xff]   ;;  %v1573_v29 = vld [vmem:[%s2171_s1 + $0x24c] ss:$16 sps:$4 sm:$0xff]  }
  0x1f   :  { %845 = vmatpush1.bf16.msra.mxu0 %v1476_v30  ;;  %v1516_v59 = vld [vmem:[%s2171_s1 + $0x324] ss:$16 sps:$4 sm:$0xff]   ;;  %v1524_v0 = vld [vmem:[%s2171_s1 + $0x100] ss:$16 sps:$4 sm:$0xff]   ;;  %v1568_v30 = vld [vmem:[%s2171_s1 + $0x48] ss:$16 sps:$4 sm:$0xff]  }
  0x20   :  { %898 = vmatpush1.bf16.msra.mxu1 %v1477_v31  ;;  %846 = vmatprep.subr.bf16.mxu0 %v1478_v32  ;;  %v1520_v62 = vld [vmem:[%s2171_s1 + $0x104] ss:$16 sps:$4 sm:$0xff]   ;;  %v1525_v1 = vld [vmem:[%s2171_s1 + $0x300] ss:$16 sps:$4 sm:$0xff]   ;;  %v1571_v31 = vld [vmem:[%s2171_s1 + $0x248] ss:$16 sps:$4 sm:$0xff]  }
  0x21   :  { %899 = vmatprep.subr.bf16.mxu1 %v1480_v33  ;;  %v1522_v63 = vld [vmem:[%s2171_s1 + $0x304] ss:$16 sps:$4 sm:$0xff]   ;;  %v1874_v4 = vld [vmem:[%s2172_s0] ss:$16 sps:$4 sm:$0xff]   ;;  %v1576_v32 = vld [vmem:[%s2171_s1 + $0x2c] ss:$16 sps:$4 sm:$0xff]  }
  0x22   :  { %v1896_v10 = vld [vmem:[%s2172_s0 + $0x24] ss:$16 sps:$4 sm:$0xff]   ;;  %v1922_v16 = vld [vmem:[%s2172_s0 + $0x20] ss:$16 sps:$4 sm:$0xff]   ;;  %v1579_v33 = vld [vmem:[%s2171_s1 + $0x22c] ss:$16 sps:$4 sm:$0xff]  }
  0x23   :  { %847 = vmatpush2.bf16.msra.mxu0 %v1482_v34  ;;  %v1574_v34 = vld [vmem:[%s2171_s1 + $0x28] ss:$16 sps:$4 sm:$0xff]  }
  0x24   :  { %900 = vmatpush2.bf16.msra.mxu1 %v1483_v35  ;;  %848 = vmatprep.subr.bf16.mxu0 %v1484_v36  ;;  %v1577_v35 = vld [vmem:[%s2171_s1 + $0x228] ss:$16 sps:$4 sm:$0xff]   ;;  %v1582_v36 = vld [vmem:[%s2171_s1 + $0xc] ss:$16 sps:$4 sm:$0xff]  }
  0x25   :  { %901 = vmatprep.subr.bf16.mxu1 %v1486_v37  ;;  %v1585_v37 = vld [vmem:[%s2171_s1 + $0x20c] ss:$16 sps:$4 sm:$0xff]  }
  0x27   :  { %849 = vmatpush2.bf16.msra.mxu0 %v1488_v38  ;;  %v1580_v38 = vld [vmem:[%s2171_s1 + $0x8] ss:$16 sps:$4 sm:$0xff]  }
  0x28   :  { %902 = vmatpush2.bf16.msra.mxu1 %v1489_v39  ;;  %850 = vmatprep.subr.bf16.mxu0 %v1490_v40  ;;  %v1583_v39 = vld [vmem:[%s2171_s1 + $0x208] ss:$16 sps:$4 sm:$0xff]   ;;  %v1588_v40 = vld [vmem:[%s2171_s1 + $0x1ec] ss:$16 sps:$4 sm:$0xff]  }
  0x29   :  { %903 = vmatprep.subr.bf16.mxu1 %v1492_v41  ;;  %v1591_v41 = vld [vmem:[%s2171_s1 + $0x3ec] ss:$16 sps:$4 sm:$0xff]  }
  0x2b   :  { %851 = vmatpush2.bf16.msra.mxu0 %v1494_v42  ;;  %v1586_v42 = vld [vmem:[%s2171_s1 + $0x1e8] ss:$16 sps:$4 sm:$0xff]  }
  0x2c   :  { %904 = vmatpush2.bf16.msra.mxu1 %v1495_v43  ;;  %852 = vmatprep.subr.bf16.mxu0 %v1496_v44  ;;  %v1589_v43 = vld [vmem:[%s2171_s1 + $0x3e8] ss:$16 sps:$4 sm:$0xff]   ;;  %v1594_v44 = vld [vmem:[%s2171_s1 + $0x1cc] ss:$16 sps:$4 sm:$0xff]  }
  0x2d   :  { %905 = vmatprep.subr.bf16.mxu1 %v1498_v45  ;;  %v1597_v45 = vld [vmem:[%s2171_s1 + $0x3cc] ss:$16 sps:$4 sm:$0xff]  }
  0x2f   :  { %853 = vmatpush2.bf16.msra.mxu0 %v1500_v46  ;;  %v1592_v46 = vld [vmem:[%s2171_s1 + $0x1c8] ss:$16 sps:$4 sm:$0xff]  }
  0x30   :  { %906 = vmatpush2.bf16.msra.mxu1 %v1501_v47  ;;  %854 = vmatprep.subr.bf16.mxu0 %v1502_v48  ;;  %v1595_v47 = vld [vmem:[%s2171_s1 + $0x3c8] ss:$16 sps:$4 sm:$0xff]   ;;  %v1600_v48 = vld [vmem:[%s2171_s1 + $0x1ac] ss:$16 sps:$4 sm:$0xff]  }
  0x31   :  { %907 = vmatprep.subr.bf16.mxu1 %v1504_v50  ;;  %v1598_v50 = vld [vmem:[%s2171_s1 + $0x1a8] ss:$16 sps:$4 sm:$0xff]  }
  0x33   :  { %855 = vmatpush2.bf16.msra.mxu0 %v1506_v52  ;;  %v1606_v52 = vld [vmem:[%s2171_s1 + $0x18c] ss:$16 sps:$4 sm:$0xff]  }
  0x34   :  { %908 = vmatpush2.bf16.msra.mxu1 %v1507_v53  ;;  %856 = vmatprep.subr.bf16.mxu0 %v1508_v54  ;;  %v1609_v53 = vld [vmem:[%s2171_s1 + $0x38c] ss:$16 sps:$4 sm:$0xff]   ;;  %v1604_v54 = vld [vmem:[%s2171_s1 + $0x188] ss:$16 sps:$4 sm:$0xff]  }
  0x35   :  { %909 = vmatprep.subr.bf16.mxu1 %v1510_v55  ;;  %v1607_v55 = vld [vmem:[%s2171_s1 + $0x388] ss:$16 sps:$4 sm:$0xff]  }
  0x37   :  { %857 = vmatpush2.bf16.msra.mxu0 %v1512_v56  ;;  %v1612_v56 = vld [vmem:[%s2171_s1 + $0x16c] ss:$16 sps:$4 sm:$0xff]  }
  0x38   :  { %910 = vmatpush2.bf16.msra.mxu1 %v1513_v57  ;;  %858 = vmatprep.subr.bf16.mxu0 %v1514_v58  ;;  %v1615_v57 = vld [vmem:[%s2171_s1 + $0x36c] ss:$16 sps:$4 sm:$0xff]   ;;  %v1610_v58 = vld [vmem:[%s2171_s1 + $0x168] ss:$16 sps:$4 sm:$0xff]  }
  0x39   :  { %911 = vmatprep.subr.bf16.mxu1 %v1516_v59  ;;  %v1613_v59 = vld [vmem:[%s2171_s1 + $0x368] ss:$16 sps:$4 sm:$0xff]  }
  0x3b   :  { %859 = vmatpush2.bf16.msra.mxu0 %v1518_v60  ;;  %v1618_v60 = vld [vmem:[%s2171_s1 + $0x14c] ss:$16 sps:$4 sm:$0xff]  }
  0x3c   :  { %912 = vmatpush2.bf16.msra.mxu1 %v1519_v61  ;;  %860 = vmatprep.subr.bf16.mxu0 %v1520_v62  ;;  %v1621_v61 = vld [vmem:[%s2171_s1 + $0x34c] ss:$16 sps:$4 sm:$0xff]   ;;  %v1616_v62 = vld [vmem:[%s2171_s1 + $0x148] ss:$16 sps:$4 sm:$0xff]  }
  0x3d   :  { %913 = vmatprep.subr.bf16.mxu1 %v1522_v63  ;;  %v1619_v63 = vld [vmem:[%s2171_s1 + $0x348] ss:$16 sps:$4 sm:$0xff]  }
  0x3f   :  { %861 = vmatpush2.bf16.msra.mxu0 %v1524_v0  ;;  %v1624_v0 = vld [vmem:[%s2171_s1 + $0x12c] ss:$16 sps:$4 sm:$0xff]  }
  0x40   :  { %914 = vmatpush2.bf16.msra.mxu1 %v1525_v1  ;;  %936 = vmatprep.subr.bf16.mxu0 %v1534_v2  ;;  %v1627_v1 = vld [vmem:[%s2171_s1 + $0x32c] ss:$16 sps:$4 sm:$0xff]   ;;  %v1622_v2 = vld [vmem:[%s2171_s1 + $0x128] ss:$16 sps:$4 sm:$0xff]  }
  0x41   :  { %989 = vmatprep.subr.bf16.mxu1 %v1537_v3  ;;  %v1625_v3 = vld [vmem:[%s2171_s1 + $0x328] ss:$16 sps:$4 sm:$0xff]  }
  0x42   :  { %863 = vmatmul.mubr.bf16.vlgmr.msra.gmra.mxu0 %v1874_v4 }
  0x43   :  { %916 = vmatmul.mubr.bf16.vlgmr.msra.gmra.mxu1 %v1879_v5  ;;  %937 = vmatpush1.bf16.msra.mxu0 %v1532_v6  ;;  %v1630_v6 = vld [vmem:[%s2171_s1 + $0x10c] ss:$16 sps:$4 sm:$0xff]  }
  0x44   :  { %990 = vmatpush1.bf16.msra.mxu1 %v1535_v7  ;;  %938 = vmatprep.subr.bf16.mxu0 %v1540_v8  ;;  %v1633_v7 = vld [vmem:[%s2171_s1 + $0x30c] ss:$16 sps:$4 sm:$0xff]   ;;  %v1628_v8 = vld [vmem:[%s2171_s1 + $0x108] ss:$16 sps:$4 sm:$0xff]  }
  0x45   :  { %991 = vmatprep.subr.bf16.mxu1 %v1543_v9  ;;  %872 = vmatprep.mubr.bf16.mxu0 %v1896_v10  ;;  %v1631_v9 = vld [vmem:[%s2171_s1 + $0x308] ss:$16 sps:$4 sm:$0xff]  }
  0x46   :  { %925 = vmatprep.mubr.bf16.mxu1 %v1901_v11 }
  0x47   :  { %939 = vmatpush1.bf16.msra.mxu0 %v1538_v12  ;;  %v1046_v12 = vlaneseq }
  0x48   :  { %992 = vmatpush1.bf16.msra.mxu1 %v1541_v13  ;;  %940 = vmatprep.subr.bf16.mxu0 %v1552_v14  ;;  %v1634_v14 = vmov 0.0  }
  0x49   :  { %993 = vmatprep.subr.bf16.mxu1 %v1555_v15  ;;  %vm2102_vm0 = vcmp.lt.s32.totalorder %v1046_v12, 512 }
  0x4a   :  { %873 = vmatmul.mubr.bf16.gmra.mxu0 %v1922_v16  ;;  %1050 = vst.msk [vmem:[%s2173_s3] sm:$0xf] %vm2102_vm0, %v1634_v14  ;;  %1051 = vst.msk [vmem:[%s2174_s4] sm:$0xf] %vm2102_vm0, %v1634_v14 }
  0x4b   :  { %926 = vmatmul.mubr.bf16.gmra.mxu1 %v1927_v17  ;;  %941 = vmatpush1.bf16.msra.mxu0 %v1550_v18 }
  0x4c   :  { %994 = vmatpush1.bf16.msra.mxu1 %v1553_v19  ;;  %942 = vmatprep.subr.bf16.mxu0 %v1558_v20 }
  0x4d   :  { %995 = vmatprep.subr.bf16.mxu1 %v1561_v21  ;;  %968 = vmatprep.mubr.bf16.mxu0 %v1811_v49  ;;  %v1603_v49 = vld [vmem:[%s2171_s1 + $0x3ac] ss:$16 sps:$4 sm:$0xff]  }
  0x4e   :  { %1021 = vmatprep.mubr.bf16.mxu1 %v1819_v51  ;;  %v1601_v51 = vld [vmem:[%s2171_s1 + $0x3a8] ss:$16 sps:$4 sm:$0xff]  }
  0x4f   :  { %943 = vmatpush1.bf16.msra.mxu0 %v1556_v22 }
  0x50   :  { %996 = vmatpush1.bf16.msra.mxu1 %v1559_v23  ;;  %944 = vmatprep.subr.bf16.mxu0 %v1564_v24 }
  0x51   :  { %997 = vmatprep.subr.bf16.mxu1 %v1567_v25 }
  0x53   :  { %945 = vmatpush1.bf16.msra.mxu0 %v1562_v26 }
  0x54   :  { %998 = vmatpush1.bf16.msra.mxu1 %v1565_v27  ;;  %946 = vmatprep.subr.bf16.mxu0 %v1570_v28 }
  0x55   :  { %999 = vmatprep.subr.bf16.mxu1 %v1573_v29 }
  0x57   :  { %947 = vmatpush1.bf16.msra.mxu0 %v1568_v30 }
  0x58   :  { %1000 = vmatpush1.bf16.msra.mxu1 %v1571_v31  ;;  %948 = vmatprep.subr.bf16.mxu0 %v1576_v32 }
  0x59   :  { %1001 = vmatprep.subr.bf16.mxu1 %v1579_v33 }
  0x5b   :  { %949 = vmatpush1.bf16.msra.mxu0 %v1574_v34 }
  0x5c   :  { %1002 = vmatpush1.bf16.msra.mxu1 %v1577_v35  ;;  %950 = vmatprep.subr.bf16.mxu0 %v1582_v36 }
  0x5d   :  { %1003 = vmatprep.subr.bf16.mxu1 %v1585_v37 }
  0x5f   :  { %951 = vmatpush1.bf16.msra.mxu0 %v1580_v38 }
  0x60   :  { %1004 = vmatpush1.bf16.msra.mxu1 %v1583_v39  ;;  %952 = vmatprep.subr.bf16.mxu0 %v1588_v40 }
  0x61   :  { %1005 = vmatprep.subr.bf16.mxu1 %v1591_v41 }
  0x63   :  { %953 = vmatpush2.bf16.msra.mxu0 %v1586_v42 }
  0x64   :  { %1006 = vmatpush2.bf16.msra.mxu1 %v1589_v43  ;;  %954 = vmatprep.subr.bf16.mxu0 %v1594_v44 }
  0x65   :  { %1007 = vmatprep.subr.bf16.mxu1 %v1597_v45 }
  0x67   :  { %955 = vmatpush2.bf16.msra.mxu0 %v1592_v46 }
  0x68   :  { %1008 = vmatpush2.bf16.msra.mxu1 %v1595_v47  ;;  %956 = vmatprep.subr.bf16.mxu0 %v1600_v48 }
  0x69   :  { %1009 = vmatprep.subr.bf16.mxu1 %v1603_v49 }
  0x6b   :  { %957 = vmatpush2.bf16.msra.mxu0 %v1598_v50 }
  0x6c   :  { %1010 = vmatpush2.bf16.msra.mxu1 %v1601_v51  ;;  %958 = vmatprep.subr.bf16.mxu0 %v1606_v52 }
  0x6d   :  { %1011 = vmatprep.subr.bf16.mxu1 %v1609_v53 }
  0x6f   :  { %959 = vmatpush2.bf16.msra.mxu0 %v1604_v54 }
  0x70   :  { %1012 = vmatpush2.bf16.msra.mxu1 %v1607_v55  ;;  %960 = vmatprep.subr.bf16.mxu0 %v1612_v56 }
  0x71   :  { %1013 = vmatprep.subr.bf16.mxu1 %v1615_v57 }
  0x73   :  { %961 = vmatpush2.bf16.msra.mxu0 %v1610_v58 }
  0x74   :  { %1014 = vmatpush2.bf16.msra.mxu1 %v1613_v59  ;;  %962 = vmatprep.subr.bf16.mxu0 %v1618_v60 }
  0x75   :  { %1015 = vmatprep.subr.bf16.mxu1 %v1621_v61 }
  0x77   :  { %963 = vmatpush2.bf16.msra.mxu0 %v1616_v62 }
  0x78   :  { %1016 = vmatpush2.bf16.msra.mxu1 %v1619_v63  ;;  %964 = vmatprep.subr.bf16.mxu0 %v1624_v0  ;;  %v1635_v63 = vmov 1966171168  }
  0x79   :  { %1017 = vmatprep.subr.bf16.mxu1 %v1627_v1  ;;  %v1096_v0 = vunpack.c.l.s4 %v1635_v63 }
  0x7b   :  { %965 = vmatpush2.bf16.msra.mxu0 %v1622_v2 }
  0x7c   :  { %1018 = vmatpush2.bf16.msra.mxu1 %v1625_v3  ;;  %966 = vmatprep.subr.bf16.mxu0 %v1630_v6 }
  0x7d   :  { %1019 = vmatprep.subr.bf16.mxu1 %v1633_v7 }
  0x7f   :  { %967 = vmatpush2.bf16.msra.mxu0 %v1628_v8 }
  0x80   :  { %1020 = vmatpush2.bf16.msra.mxu1 %v1631_v9 }
  0x82   :  { %969 = vmatmul.mubr.bf16.vlgmr.msra.gmra.mxu0 %v1874_v4 }
  0x83   :  { %1022 = vmatmul.mubr.bf16.vlgmr.msra.gmra.mxu1 %v1879_v5  ;;  %978 = vmatprep.mubr.bf16.mxu0 %v1896_v10 }
  0x84   :  { %1031 = vmatprep.mubr.bf16.mxu1 %v1901_v11 }
  0x8a   :  { %979 = vmatmul.mubr.bf16.gmra.mxu0 %v1922_v16 }
  0x8b   :  { %1032 = vmatmul.mubr.bf16.gmra.mxu1 %v1927_v17 }
 0x102   :  { %v864_v4 = vpop.f32.mrf.mxu0 }
 0x103   :  { %v917_v5 = vpop.f32.mrf.mxu1 }
 0x104   :  { %v918_v10 = vadd.f32 %v917_v5, %v864_v4  ;;  %v866_v11 = vpop.f32.mrf.mxu0  ;;  %v1097_v4 = vunpack.c.0.s8 %v1096_v0  ;;  %v1099_v5 = vshrl.u32 %v1046_v12, 7 }
 0x105   :  { %v919_v15 = vpop.f32.mrf.mxu1 }
 0x106   :  { %v920_v16 = vadd.f32 %v919_v15, %v866_v11  ;;  %v868_v17 = vpop.f32.mrf.mxu0  ;;  %v1125_v23 = vmul.f32 %v918_v10, %v918_v10 }
 0x107   :  { %v921_v18 = vpop.f32.mrf.mxu1 }
 0x108   :  { %v1420_v19 = vpack.c.bf16 %v920_v16, %v918_v10  ;;  %v922_v20 = vadd.f32 %v921_v18, %v868_v17  ;;  %v870_v21 = vpop.f32.mrf.mxu0  ;;  %v1126_v27 = vmul.f32 %v920_v16, %v920_v16 }
 0x109   :  { %v923_v22 = vpop.f32.mrf.mxu1 }
 0x10a   :  { %1256 = vst [vmem:[%s2175_s2] sm:$0xff] %v1420_v19  ;;  %v1053_v24 = vadd.f32 %v922_v20, %v918_v10  ;;  %v1129_v25 = vmul.f32 %v922_v20, %v922_v20  ;;  %v924_v26 = vadd.f32 %v923_v22, %v870_v21  ;;  %v874_v28 = vpop.f32.mrf.mxu0  ;;  %v2129_v22 = vsub.s32 %v1097_v4, %v1099_v5 }
 0x10b   :  { %v927_v29 = vpop.f32.mrf.mxu1 }
 0x10c   :  { %v1141_v30 = vadd.f32 %v1129_v25, %v1125_v23  ;;  %v1062_v31 = vadd.f32 %v924_v26, %v920_v16  ;;  %v1130_v32 = vmul.f32 %v924_v26, %v924_v26  ;;  %v1422_v33 = vpack.c.bf16 %v924_v26, %v922_v20  ;;  %v876_v35 = vpop.f32.mrf.mxu0 }
 0x10d   :  { %v928_v34 = vadd.f32 %v927_v29, %v874_v28  ;;  %v929_v36 = vpop.f32.mrf.mxu1 }
 0x10e   :  { %v1150_v37 = vadd.f32 %v1130_v32, %v1126_v27  ;;  %1258 = vst [vmem:[%s2175_s2 + $0x10] sm:$0xff] %v1422_v33  ;;  %v930_v38 = vadd.f32 %v929_v36, %v876_v35  ;;  %v878_v41 = vpop.f32.mrf.mxu0 }
 0x10f   :  { %v1054_v39 = vadd.f32 %v1053_v24, %v928_v34  ;;  %v1133_v40 = vmul.f32 %v928_v34, %v928_v34  ;;  %v931_v42 = vpop.f32.mrf.mxu1 }
 0x110   :  { %v1063_v43 = vadd.f32 %v1062_v31, %v930_v38  ;;  %v1134_v44 = vmul.f32 %v930_v38, %v930_v38  ;;  %v1424_v45 = vpack.c.bf16 %v930_v38, %v928_v34  ;;  %v932_v46 = vadd.f32 %v931_v42, %v878_v41  ;;  %v880_v48 = vpop.f32.mrf.mxu0 }
 0x111   :  { %v1142_v47 = vadd.f32 %v1141_v30, %v1133_v40  ;;  %v933_v49 = vpop.f32.mrf.mxu1 }
 0x112   :  { %v1151_v50 = vadd.f32 %v1150_v37, %v1134_v44  ;;  %1260 = vst [vmem:[%s2175_s2 + $0x20] sm:$0xff] %v1424_v45  ;;  %v1055_v51 = vadd.f32 %v1054_v39, %v932_v46  ;;  %v1137_v52 = vmul.f32 %v932_v46, %v932_v46  ;;  %v934_v53 = vadd.f32 %v933_v49, %v880_v48 }
 0x114   :  { %v1056_v54 = vrot.slane %v1055_v51, 4  ;;  %v1143_v55 = vadd.f32 %v1142_v47, %v1137_v52  ;;  %v1064_v56 = vadd.f32 %v1063_v43, %v934_v53  ;;  %v1138_v57 = vmul.f32 %v934_v53, %v934_v53 }
 0x115   :  { %v1426_v58 = vpack.c.bf16 %v934_v53, %v932_v46 }
 0x116   :  { %v1057_v59 = vadd.f32 %v1056_v54, %v1055_v51  ;;  %v1144_v60 = vrot.slane %v1143_v55, 4  ;;  %v1065_v61 = vrot.slane %v1064_v56, 4  ;;  %v1152_v62 = vadd.f32 %v1151_v50, %v1138_v57 }
 0x117   :  { %1262 = vst [vmem:[%s2175_s2 + $0x30] sm:$0xff] %v1426_v58 }
 0x118   :  { %v1058_v1 = vrot.slane %v1057_v59, 2  ;;  %v1145_v2 = vadd.f32 %v1144_v60, %v1143_v55  ;;  %v1066_v3 = vadd.f32 %v1065_v61, %v1064_v56  ;;  %v1153_v6 = vrot.slane %v1152_v62, 4 }
 0x11a   :  { %v1059_v7 = vadd.f32 %v1058_v1, %v1057_v59  ;;  %v1146_v8 = vrot.slane %v1145_v2, 2  ;;  %v1067_v9 = vrot.slane %v1066_v3, 2  ;;  %v1154_v14 = vadd.f32 %v1153_v6, %v1152_v62 }
 0x11c   :  { %v1060_v10 = vrot.slane %v1059_v7, 1  ;;  %v1147_v11 = vadd.f32 %v1146_v8, %v1145_v2  ;;  %v1068_v15 = vadd.f32 %v1067_v9, %v1066_v3  ;;  %v1155_v16 = vrot.slane %v1154_v14, 2 }
 0x11e   :  { %v1148_v17 = vrot.slane %v1147_v11, 1  ;;  %v1069_v18 = vrot.slane %v1068_v15, 1  ;;  %v1156_v19 = vadd.f32 %v1155_v16, %v1154_v14  ;;  %v1061_v20 = vadd.f32 %v1060_v10, %v1059_v7 }
 0x120   :  { %v1070_v21 = vadd.f32 %v1069_v18, %v1068_v15  ;;  %v1157_v23 = vrot.slane %v1156_v19, 1  ;;  %v1149_v24 = vadd.f32 %v1148_v17, %v1147_v11 }
 0x122   :  { %v1093_v25 = vcombine.low %v1061_v20, %v1070_v21  ;;  %v1158_v26 = vadd.f32 %v1157_v23, %v1156_v19 }
 0x124   :  { %v2132_v27 = vrot.slane %v1093_v25, %v2129_v22  ;;  %v1181_v28 = vcombine.low %v1149_v24, %v1158_v26 }
 0x126   :  { %v2135_v12 = vrot.slane %v1181_v28, %v2129_v22 }
 0x142   :  { %v970_v29 = vpop.f32.mrf.mxu0 }
 0x143   :  { %v1023_v30 = vpop.f32.mrf.mxu1 }
 0x144   :  { %v972_v31 = vpop.f32.mrf.mxu0  ;;  %v1024_v33 = vadd.f32 %v1023_v30, %v970_v29 }
 0x145   :  { %v1025_v32 = vpop.f32.mrf.mxu1 }
 0x146   :  { %v1026_v34 = vadd.f32 %v1025_v32, %v972_v31  ;;  %v974_v35 = vpop.f32.mrf.mxu0  ;;  %v1127_v46 = vmul.f32 %v1024_v33, %v1024_v33 }
 0x147   :  { %v1027_v36 = vpop.f32.mrf.mxu1 }
 0x148   :  { %v1421_v37 = vpack.c.bf16 %v1026_v34, %v1024_v33  ;;  %v1028_v38 = vadd.f32 %v1027_v36, %v974_v35  ;;  %v976_v39 = vpop.f32.mrf.mxu0  ;;  %v1128_v53 = vmul.f32 %v1026_v34, %v1026_v34 }
 0x149   :  { %v1029_v40 = vpop.f32.mrf.mxu1 }
 0x14a   :  { %1257 = vst [vmem:[%s2175_s2 + $0x8] sm:$0xff] %v1421_v37  ;;  %v1030_v41 = vadd.f32 %v1029_v40, %v976_v39  ;;  %v1131_v42 = vmul.f32 %v1028_v38, %v1028_v38  ;;  %v980_v43 = vpop.f32.mrf.mxu0  ;;  %v1071_v51 = vadd.f32 %v1028_v38, %v1024_v33 }
 0x14b   :  { %v1033_v44 = vpop.f32.mrf.mxu1 }
 0x14c   :  { %v1423_v45 = vpack.c.bf16 %v1030_v41, %v1028_v38  ;;  %v1132_v47 = vmul.f32 %v1030_v41, %v1030_v41  ;;  %v1034_v48 = vadd.f32 %v1033_v44, %v980_v43  ;;  %v982_v49 = vpop.f32.mrf.mxu0  ;;  %v1159_v54 = vadd.f32 %v1131_v42, %v1127_v46  ;;  %v1052_v46 = vld [vmem:[%s2173_s3] sm:$0xf] }
 0x14d   :  { %v1035_v50 = vpop.f32.mrf.mxu1  ;;  %v1080_v55 = vadd.f32 %v1030_v41, %v1026_v34 }
 0x14e   :  { %1259 = vst [vmem:[%s2175_s2 + $0x18] sm:$0xff] %v1423_v45  ;;  %v1036_v52 = vadd.f32 %v1035_v50, %v982_v49  ;;  %v1135_v56 = vmul.f32 %v1034_v48, %v1034_v48  ;;  %v984_v57 = vpop.f32.mrf.mxu0  ;;  %v1072_v59 = vadd.f32 %v1071_v51, %v1034_v48  ;;  %v1168_v63 = vadd.f32 %v1132_v47, %v1128_v53  ;;  %v1124_v49 = vld [vmem:[%s2174_s4] sm:$0xf] }
 0x14f   :  { %v1037_v58 = vpop.f32.mrf.mxu1 }
 0x150   :  { %v1136_v60 = vmul.f32 %v1036_v52, %v1036_v52  ;;  %v1425_v61 = vpack.c.bf16 %v1036_v52, %v1034_v48  ;;  %v1038_v62 = vadd.f32 %v1037_v58, %v984_v57  ;;  %v1081_v0 = vadd.f32 %v1080_v55, %v1036_v52  ;;  %v986_v1 = vpop.f32.mrf.mxu0 }
 0x151   :  { %v1039_v2 = vpop.f32.mrf.mxu1  ;;  %v1160_v3 = vadd.f32 %v1159_v54, %v1135_v56 }
 0x152   :  { %1261 = vst [vmem:[%s2175_s2 + $0x28] sm:$0xff] %v1425_v61  ;;  %v1073_v6 = vadd.f32 %v1072_v59, %v1038_v62  ;;  %v1139_v7 = vmul.f32 %v1038_v62, %v1038_v62  ;;  %v1040_v8 = vadd.f32 %v1039_v2, %v986_v1  ;;  %v1169_v9 = vadd.f32 %v1168_v63, %v1136_v60 }
 0x154   :  { %v1074_v14 = vrot.slane %v1073_v6, 4  ;;  %v1161_v4 = vadd.f32 %v1160_v3, %v1139_v7  ;;  %v1082_v5 = vadd.f32 %v1081_v0, %v1040_v8  ;;  %v1140_v10 = vmul.f32 %v1040_v8, %v1040_v8 }
 0x155   :  { %v1427_v11 = vpack.c.bf16 %v1040_v8, %v1038_v62 }
 0x156   :  { %v1075_v15 = vadd.f32 %v1074_v14, %v1073_v6  ;;  %v1162_v16 = vrot.slane %v1161_v4, 4  ;;  %v1083_v17 = vrot.slane %v1082_v5, 4  ;;  %v1170_v18 = vadd.f32 %v1169_v9, %v1140_v10 }
 0x157   :  { %1263 = vst [vmem:[%s2175_s2 + $0x38] sm:$0xff] %v1427_v11 }
 0x158   :  { %v1076_v19 = vrot.slane %v1075_v15, 2  ;;  %v1163_v20 = vadd.f32 %v1162_v16, %v1161_v4  ;;  %v1084_v21 = vadd.f32 %v1083_v17, %v1082_v5  ;;  %v1171_v23 = vrot.slane %v1170_v18, 4 }
 0x15a   :  { %v1077_v24 = vadd.f32 %v1076_v19, %v1075_v15  ;;  %v1164_v25 = vrot.slane %v1163_v20, 2  ;;  %v1085_v26 = vrot.slane %v1084_v21, 2  ;;  %v1172_v28 = vadd.f32 %v1171_v23, %v1170_v18 }
 0x15c   :  { %v1078_v29 = vrot.slane %v1077_v24, 1  ;;  %v1165_v30 = vadd.f32 %v1164_v25, %v1163_v20  ;;  %v1086_v31 = vadd.f32 %v1085_v26, %v1084_v21  ;;  %v1173_v32 = vrot.slane %v1172_v28, 2 }
 0x15e   :  { %v1166_v33 = vrot.slane %v1165_v30, 1  ;;  %v1087_v34 = vrot.slane %v1086_v31, 1  ;;  %v1174_v35 = vadd.f32 %v1173_v32, %v1172_v28  ;;  %v1079_v36 = vadd.f32 %v1078_v29, %v1077_v24 }
 0x160   :  { %v1088_v37 = vadd.f32 %v1087_v34, %v1086_v31  ;;  %v1175_v38 = vrot.slane %v1174_v35, 1  ;;  %v1167_v39 = vadd.f32 %v1166_v33, %v1165_v30 }
 0x162   :  { %v1094_v40 = vcombine.low %v1079_v36, %v1088_v37  ;;  %v1176_v41 = vadd.f32 %v1175_v38, %v1174_v35 }
 0x164   :  { %v1108_v42 = vrot.slane %v1094_v40, %v2129_v22  ;;  %v1182_v43 = vcombine.low %v1167_v39, %v1176_v41 }
 0x166   :  { %v1109_v44 = vcombine.low %v2132_v27, %v1108_v42  ;;  %v1196_v45 = vrot.slane %v1182_v43, %v2129_v22 }
 0x168   :  { %v1116_v47 = vrot.slane %v1109_v44, %v2129_v22  ;;  %v1197_v48 = vcombine.low %v2135_v12, %v1196_v45 }
 0x16a   :  { %v1118_v50 = vadd.f32 %v1116_v47, %v1052_v46  ;;  %v1204_v51 = vrot.slane %v1197_v48, %v2129_v22 }
 0x16c   :  { %1123 = vst.msk [vmem:[%s2173_s3] sm:$0xf] %vm2102_vm0, %v1118_v50  ;;  %v1206_v27 = vadd.f32 %v1204_v51, %v1124_v49 }
 0x16e   :  { %1207 = vst.msk [vmem:[%s2174_s4] sm:$0xf] %vm2102_vm0, %v1206_v27 }

// kernel: _lambda_.9
= control target key start
LH: loop header
LB: loop body
LE: loop exit
PB: predicated region body
PF: predicated region fallthrough
CT: control target
= control target key end

     0   :  { %s2882_s1 = inlined_call_operand.vmem [shape: bf16[512,512], index: 1, kind: input, shape index: {}]   ;;  %s2883_s0 = inlined_call_operand.vmem [shape: bf16[128,512], index: 0, kind: input, shape index: {}]   ;;  %s2884_s2 = inlined_call_operand.vmem [shape: f32[128,512], index: 2, kind: output, shape index: {}]  }
   0x1   :  { %v1715_v0 = vld [vmem:[%s2882_s1 + $0xe4] ss:$16 sps:$4 sm:$0xff]   ;;  %v1719_v2 = vld [vmem:[%s2882_s1 + $0xe0] ss:$16 sps:$4 sm:$0xff]   ;;  %v2256_v51 = vld [vmem:[%s2883_s0 + $0xc] ss:$16 sps:$4 sm:$0xff]  }
   0x2   :  { %v1717_v1 = vld [vmem:[%s2882_s1 + $0x2e4] ss:$16 sps:$4 sm:$0xff]   ;;  %971 = vmatprep.subr.bf16.mxu0 %v1715_v0  ;;  %v1720_v3 = vld [vmem:[%s2882_s1 + $0x2e0] ss:$16 sps:$4 sm:$0xff]   ;;  %1116 = vmatprep.mubr.bf16.mxu1 %v2256_v51 }
   0x3   :  { %1084 = vmatprep.subr.bf16.mxu1 %v1717_v1  ;;  %v1721_v4 = vld [vmem:[%s2882_s1 + $0xc4] ss:$16 sps:$4 sm:$0xff]   ;;  %972 = vmatpush1.bf16.msra.mxu0 %v1719_v2  ;;  %v1725_v6 = vld [vmem:[%s2882_s1 + $0xc0] ss:$16 sps:$4 sm:$0xff]   ;;  %v1819_v2 = vld [vmem:[%s2882_s1 + $0xec] ss:$16 sps:$4 sm:$0xff]  }
   0x4   :  { %1085 = vmatpush1.bf16.msra.mxu1 %v1720_v3  ;;  %v1723_v5 = vld [vmem:[%s2882_s1 + $0x2c4] ss:$16 sps:$4 sm:$0xff]   ;;  %973 = vmatprep.subr.bf16.mxu0 %v1721_v4  ;;  %v1726_v7 = vld [vmem:[%s2882_s1 + $0x2c0] ss:$16 sps:$4 sm:$0xff]   ;;  %v1822_v3 = vld [vmem:[%s2882_s1 + $0x2ec] ss:$16 sps:$4 sm:$0xff]  }
   0x5   :  { %1086 = vmatprep.subr.bf16.mxu1 %v1723_v5  ;;  %v1727_v8 = vld [vmem:[%s2882_s1 + $0xa4] ss:$16 sps:$4 sm:$0xff]   ;;  %v1731_v10 = vld [vmem:[%s2882_s1 + $0xa0] ss:$16 sps:$4 sm:$0xff]   ;;  %v2316_v5 = vld [vmem:[%s2883_s0 + $0x8] ss:$16 sps:$4 sm:$0xff]  }
   0x6   :  { %v1729_v9 = vld [vmem:[%s2882_s1 + $0x2a4] ss:$16 sps:$4 sm:$0xff]   ;;  %v1732_v11 = vld [vmem:[%s2882_s1 + $0x2a0] ss:$16 sps:$4 sm:$0xff]  }
   0x7   :  { %974 = vmatpush1.bf16.msra.mxu0 %v1725_v6  ;;  %v1733_v12 = vld [vmem:[%s2882_s1 + $0x84] ss:$16 sps:$4 sm:$0xff]   ;;  %v1737_v14 = vld [vmem:[%s2882_s1 + $0x80] ss:$16 sps:$4 sm:$0xff]   ;;  %v1817_v6 = vld [vmem:[%s2882_s1 + $0xe8] ss:$16 sps:$4 sm:$0xff]  }
   0x8   :  { %1087 = vmatpush1.bf16.msra.mxu1 %v1726_v7  ;;  %975 = vmatprep.subr.bf16.mxu0 %v1727_v8  ;;  %v1735_v13 = vld [vmem:[%s2882_s1 + $0x284] ss:$16 sps:$4 sm:$0xff]   ;;  %v1738_v15 = vld [vmem:[%s2882_s1 + $0x280] ss:$16 sps:$4 sm:$0xff]   ;;  %v1820_v7 = vld [vmem:[%s2882_s1 + $0x2e8] ss:$16 sps:$4 sm:$0xff]  }
   0x9   :  { %1088 = vmatprep.subr.bf16.mxu1 %v1729_v9  ;;  %v1739_v16 = vld [vmem:[%s2882_s1 + $0x64] ss:$16 sps:$4 sm:$0xff]   ;;  %v1743_v18 = vld [vmem:[%s2882_s1 + $0x60] ss:$16 sps:$4 sm:$0xff]   ;;  %v1825_v8 = vld [vmem:[%s2882_s1 + $0xcc] ss:$16 sps:$4 sm:$0xff]  }
   0xa   :  { %v1741_v17 = vld [vmem:[%s2882_s1 + $0x264] ss:$16 sps:$4 sm:$0xff]   ;;  %v1744_v19 = vld [vmem:[%s2882_s1 + $0x260] ss:$16 sps:$4 sm:$0xff]   ;;  %v1828_v9 = vld [vmem:[%s2882_s1 + $0x2cc] ss:$16 sps:$4 sm:$0xff]  }
   0xb   :  { %976 = vmatpush1.bf16.msra.mxu0 %v1731_v10  ;;  %v1745_v20 = vld [vmem:[%s2882_s1 + $0x44] ss:$16 sps:$4 sm:$0xff]   ;;  %v1749_v22 = vld [vmem:[%s2882_s1 + $0x40] ss:$16 sps:$4 sm:$0xff]  }
   0xc   :  { %1089 = vmatpush1.bf16.msra.mxu1 %v1732_v11  ;;  %977 = vmatprep.subr.bf16.mxu0 %v1733_v12  ;;  %v1747_v21 = vld [vmem:[%s2882_s1 + $0x244] ss:$16 sps:$4 sm:$0xff]   ;;  %v1750_v23 = vld [vmem:[%s2882_s1 + $0x240] ss:$16 sps:$4 sm:$0xff]   ;;  %v2338_v11 = vld [vmem:[%s2883_s0 + $0x2c] ss:$16 sps:$4 sm:$0xff]  }
   0xd   :  { %1090 = vmatprep.subr.bf16.mxu1 %v1735_v13  ;;  %v1751_v24 = vld [vmem:[%s2882_s1 + $0x24] ss:$16 sps:$4 sm:$0xff]   ;;  %v1755_v26 = vld [vmem:[%s2882_s1 + $0x20] ss:$16 sps:$4 sm:$0xff]   ;;  %v1823_v12 = vld [vmem:[%s2882_s1 + $0xc8] ss:$16 sps:$4 sm:$0xff]  }
   0xe   :  { %v1753_v25 = vld [vmem:[%s2882_s1 + $0x224] ss:$16 sps:$4 sm:$0xff]   ;;  %v1756_v27 = vld [vmem:[%s2882_s1 + $0x220] ss:$16 sps:$4 sm:$0xff]   ;;  %v1826_v13 = vld [vmem:[%s2882_s1 + $0x2c8] ss:$16 sps:$4 sm:$0xff]  }
   0xf   :  { %978 = vmatpush1.bf16.msra.mxu0 %v1737_v14  ;;  %v1757_v28 = vld [vmem:[%s2882_s1 + $0x4] ss:$16 sps:$4 sm:$0xff]   ;;  %v1761_v30 = vld [vmem:[%s2882_s1] ss:$16 sps:$4 sm:$0xff]   ;;  %v1837_v14 = vld [vmem:[%s2882_s1 + $0xac] ss:$16 sps:$4 sm:$0xff]  }
  0x10   :  { %1091 = vmatpush1.bf16.msra.mxu1 %v1738_v15  ;;  %979 = vmatprep.subr.bf16.mxu0 %v1739_v16  ;;  %v1759_v29 = vld [vmem:[%s2882_s1 + $0x204] ss:$16 sps:$4 sm:$0xff]   ;;  %v1762_v31 = vld [vmem:[%s2882_s1 + $0x200] ss:$16 sps:$4 sm:$0xff]   ;;  %v1840_v15 = vld [vmem:[%s2882_s1 + $0x2ac] ss:$16 sps:$4 sm:$0xff]  }
  0x11   :  { %1092 = vmatprep.subr.bf16.mxu1 %v1741_v17  ;;  %v1763_v32 = vld [vmem:[%s2882_s1 + $0x1e4] ss:$16 sps:$4 sm:$0xff]   ;;  %v1767_v34 = vld [vmem:[%s2882_s1 + $0x1e0] ss:$16 sps:$4 sm:$0xff]   ;;  %v2364_v17 = vld [vmem:[%s2883_s0 + $0x28] ss:$16 sps:$4 sm:$0xff]  }
  0x12   :  { %v1765_v33 = vld [vmem:[%s2882_s1 + $0x3e4] ss:$16 sps:$4 sm:$0xff]   ;;  %v1768_v35 = vld [vmem:[%s2882_s1 + $0x3e0] ss:$16 sps:$4 sm:$0xff]  }
  0x13   :  { %980 = vmatpush1.bf16.msra.mxu0 %v1743_v18  ;;  %v1769_v36 = vld [vmem:[%s2882_s1 + $0x1c4] ss:$16 sps:$4 sm:$0xff]   ;;  %v1773_v38 = vld [vmem:[%s2882_s1 + $0x1c0] ss:$16 sps:$4 sm:$0xff]   ;;  %v1835_v18 = vld [vmem:[%s2882_s1 + $0xa8] ss:$16 sps:$4 sm:$0xff]  }
  0x14   :  { %1093 = vmatpush1.bf16.msra.mxu1 %v1744_v19  ;;  %981 = vmatprep.subr.bf16.mxu0 %v1745_v20  ;;  %v1771_v37 = vld [vmem:[%s2882_s1 + $0x3c4] ss:$16 sps:$4 sm:$0xff]   ;;  %v1774_v39 = vld [vmem:[%s2882_s1 + $0x3c0] ss:$16 sps:$4 sm:$0xff]   ;;  %v1838_v19 = vld [vmem:[%s2882_s1 + $0x2a8] ss:$16 sps:$4 sm:$0xff]  }
  0x15   :  { %1094 = vmatprep.subr.bf16.mxu1 %v1747_v21  ;;  %v1775_v40 = vld [vmem:[%s2882_s1 + $0x1a4] ss:$16 sps:$4 sm:$0xff]   ;;  %v1779_v42 = vld [vmem:[%s2882_s1 + $0x1a0] ss:$16 sps:$4 sm:$0xff]   ;;  %v1843_v20 = vld [vmem:[%s2882_s1 + $0x8c] ss:$16 sps:$4 sm:$0xff]  }
  0x16   :  { %v1777_v41 = vld [vmem:[%s2882_s1 + $0x3a4] ss:$16 sps:$4 sm:$0xff]   ;;  %v1780_v43 = vld [vmem:[%s2882_s1 + $0x3a0] ss:$16 sps:$4 sm:$0xff]   ;;  %v1846_v21 = vld [vmem:[%s2882_s1 + $0x28c] ss:$16 sps:$4 sm:$0xff]  }
  0x17   :  { %982 = vmatpush1.bf16.msra.mxu0 %v1749_v22  ;;  %v1781_v44 = vld [vmem:[%s2882_s1 + $0x184] ss:$16 sps:$4 sm:$0xff]   ;;  %v1785_v46 = vld [vmem:[%s2882_s1 + $0x180] ss:$16 sps:$4 sm:$0xff]  }
  0x18   :  { %1095 = vmatpush1.bf16.msra.mxu1 %v1750_v23  ;;  %983 = vmatprep.subr.bf16.mxu0 %v1751_v24  ;;  %v1783_v45 = vld [vmem:[%s2882_s1 + $0x384] ss:$16 sps:$4 sm:$0xff]   ;;  %v1786_v47 = vld [vmem:[%s2882_s1 + $0x380] ss:$16 sps:$4 sm:$0xff]   ;;  %v2386_v23 = vld [vmem:[%s2883_s0 + $0x4c] ss:$16 sps:$4 sm:$0xff]  }
  0x19   :  { %1096 = vmatprep.subr.bf16.mxu1 %v1753_v25  ;;  %v1787_v48 = vld [vmem:[%s2882_s1 + $0x164] ss:$16 sps:$4 sm:$0xff]   ;;  %v1791_v52 = vld [vmem:[%s2882_s1 + $0x160] ss:$16 sps:$4 sm:$0xff]   ;;  %v1841_v24 = vld [vmem:[%s2882_s1 + $0x88] ss:$16 sps:$4 sm:$0xff]  }
  0x1a   :  { %v2248_v49 = vld [vmem:[%s2883_s0 + $0x4] ss:$16 sps:$4 sm:$0xff]   ;;  %v1792_v53 = vld [vmem:[%s2882_s1 + $0x360] ss:$16 sps:$4 sm:$0xff]   ;;  %v1844_v25 = vld [vmem:[%s2882_s1 + $0x288] ss:$16 sps:$4 sm:$0xff]  }
  0x1b   :  { %984 = vmatpush1.bf16.msra.mxu0 %v1755_v26  ;;  %v1789_v50 = vld [vmem:[%s2882_s1 + $0x364] ss:$16 sps:$4 sm:$0xff]   ;;  %1003 = vmatprep.mubr.bf16.mxu0 %v2248_v49  ;;  %v1797_v56 = vld [vmem:[%s2882_s1 + $0x140] ss:$16 sps:$4 sm:$0xff]   ;;  %v1855_v26 = vld [vmem:[%s2882_s1 + $0x6c] ss:$16 sps:$4 sm:$0xff]  }
  0x1c   :  { %1097 = vmatpush1.bf16.msra.mxu1 %v1756_v27  ;;  %985 = vmatprep.subr.bf16.mxu0 %v1757_v28  ;;  %v1793_v54 = vld [vmem:[%s2882_s1 + $0x144] ss:$16 sps:$4 sm:$0xff]   ;;  %v1798_v57 = vld [vmem:[%s2882_s1 + $0x340] ss:$16 sps:$4 sm:$0xff]   ;;  %v1858_v27 = vld [vmem:[%s2882_s1 + $0x26c] ss:$16 sps:$4 sm:$0xff]  }
  0x1d   :  { %1098 = vmatprep.subr.bf16.mxu1 %v1759_v29  ;;  %v1795_v55 = vld [vmem:[%s2882_s1 + $0x344] ss:$16 sps:$4 sm:$0xff]   ;;  %v1803_v60 = vld [vmem:[%s2882_s1 + $0x120] ss:$16 sps:$4 sm:$0xff]   ;;  %v2412_v29 = vld [vmem:[%s2883_s0 + $0x48] ss:$16 sps:$4 sm:$0xff]  }
  0x1e   :  { %v1799_v58 = vld [vmem:[%s2882_s1 + $0x124] ss:$16 sps:$4 sm:$0xff]   ;;  %v1804_v61 = vld [vmem:[%s2882_s1 + $0x320] ss:$16 sps:$4 sm:$0xff]  }
  0x1f   :  { %986 = vmatpush1.bf16.msra.mxu0 %v1761_v30  ;;  %v1801_v59 = vld [vmem:[%s2882_s1 + $0x324] ss:$16 sps:$4 sm:$0xff]   ;;  %v1809_v0 = vld [vmem:[%s2882_s1 + $0x100] ss:$16 sps:$4 sm:$0xff]   ;;  %v1853_v30 = vld [vmem:[%s2882_s1 + $0x68] ss:$16 sps:$4 sm:$0xff]  }
  0x20   :  { %1099 = vmatpush1.bf16.msra.mxu1 %v1762_v31  ;;  %987 = vmatprep.subr.bf16.mxu0 %v1763_v32  ;;  %v1805_v62 = vld [vmem:[%s2882_s1 + $0x104] ss:$16 sps:$4 sm:$0xff]   ;;  %v1810_v1 = vld [vmem:[%s2882_s1 + $0x300] ss:$16 sps:$4 sm:$0xff]   ;;  %v1856_v31 = vld [vmem:[%s2882_s1 + $0x268] ss:$16 sps:$4 sm:$0xff]  }
  0x21   :  { %1100 = vmatprep.subr.bf16.mxu1 %v1765_v33  ;;  %v1807_v63 = vld [vmem:[%s2882_s1 + $0x304] ss:$16 sps:$4 sm:$0xff]   ;;  %v2311_v4 = vld [vmem:[%s2883_s0] ss:$16 sps:$4 sm:$0xff]   ;;  %v1861_v32 = vld [vmem:[%s2882_s1 + $0x4c] ss:$16 sps:$4 sm:$0xff]  }
  0x22   :  { %v2333_v10 = vld [vmem:[%s2883_s0 + $0x24] ss:$16 sps:$4 sm:$0xff]   ;;  %v2359_v16 = vld [vmem:[%s2883_s0 + $0x20] ss:$16 sps:$4 sm:$0xff]   ;;  %v1864_v33 = vld [vmem:[%s2882_s1 + $0x24c] ss:$16 sps:$4 sm:$0xff]  }
  0x23   :  { %988 = vmatpush2.bf16.msra.mxu0 %v1767_v34  ;;  %v2381_v22 = vld [vmem:[%s2883_s0 + $0x44] ss:$16 sps:$4 sm:$0xff]   ;;  %v2407_v28 = vld [vmem:[%s2883_s0 + $0x40] ss:$16 sps:$4 sm:$0xff]  }
  0x24   :  { %1101 = vmatpush2.bf16.msra.mxu1 %v1768_v35  ;;  %989 = vmatprep.subr.bf16.mxu0 %v1769_v36  ;;  %v2429_v34 = vld [vmem:[%s2883_s0 + $0x64] ss:$16 sps:$4 sm:$0xff]   ;;  %v2434_v35 = vld [vmem:[%s2883_s0 + $0x6c] ss:$16 sps:$4 sm:$0xff]   ;;  %v1859_v36 = vld [vmem:[%s2882_s1 + $0x48] ss:$16 sps:$4 sm:$0xff]  }
  0x25   :  { %1102 = vmatprep.subr.bf16.mxu1 %v1771_v37  ;;  %v1862_v37 = vld [vmem:[%s2882_s1 + $0x248] ss:$16 sps:$4 sm:$0xff]  }
  0x27   :  { %990 = vmatpush2.bf16.msra.mxu0 %v1773_v38  ;;  %v1873_v38 = vld [vmem:[%s2882_s1 + $0x2c] ss:$16 sps:$4 sm:$0xff]  }
  0x28   :  { %1103 = vmatpush2.bf16.msra.mxu1 %v1774_v39  ;;  %991 = vmatprep.subr.bf16.mxu0 %v1775_v40  ;;  %v1876_v39 = vld [vmem:[%s2882_s1 + $0x22c] ss:$16 sps:$4 sm:$0xff]   ;;  %v2455_v40 = vld [vmem:[%s2883_s0 + $0x60] ss:$16 sps:$4 sm:$0xff]  }
  0x29   :  { %1104 = vmatprep.subr.bf16.mxu1 %v1777_v41  ;;  %v2460_v41 = vld [vmem:[%s2883_s0 + $0x68] ss:$16 sps:$4 sm:$0xff]  }
  0x2b   :  { %992 = vmatpush2.bf16.msra.mxu0 %v1779_v42  ;;  %v1871_v42 = vld [vmem:[%s2882_s1 + $0x28] ss:$16 sps:$4 sm:$0xff]  }
  0x2c   :  { %1105 = vmatpush2.bf16.msra.mxu1 %v1780_v43  ;;  %993 = vmatprep.subr.bf16.mxu0 %v1781_v44  ;;  %v1874_v43 = vld [vmem:[%s2882_s1 + $0x228] ss:$16 sps:$4 sm:$0xff]   ;;  %v1879_v44 = vld [vmem:[%s2882_s1 + $0xc] ss:$16 sps:$4 sm:$0xff]  }
  0x2d   :  { %1106 = vmatprep.subr.bf16.mxu1 %v1783_v45  ;;  %v1882_v45 = vld [vmem:[%s2882_s1 + $0x20c] ss:$16 sps:$4 sm:$0xff]  }
  0x2f   :  { %994 = vmatpush2.bf16.msra.mxu0 %v1785_v46  ;;  %v2477_v46 = vld [vmem:[%s2883_s0 + $0x84] ss:$16 sps:$4 sm:$0xff]  }
  0x30   :  { %1107 = vmatpush2.bf16.msra.mxu1 %v1786_v47  ;;  %995 = vmatprep.subr.bf16.mxu0 %v1787_v48  ;;  %v2482_v47 = vld [vmem:[%s2883_s0 + $0x8c] ss:$16 sps:$4 sm:$0xff]   ;;  %v1877_v48 = vld [vmem:[%s2882_s1 + $0x8] ss:$16 sps:$4 sm:$0xff]  }
  0x31   :  { %1108 = vmatprep.subr.bf16.mxu1 %v1789_v50  ;;  %v1880_v50 = vld [vmem:[%s2882_s1 + $0x208] ss:$16 sps:$4 sm:$0xff]  }
  0x33   :  { %996 = vmatpush2.bf16.msra.mxu0 %v1791_v52  ;;  %v1891_v52 = vld [vmem:[%s2882_s1 + $0x1ec] ss:$16 sps:$4 sm:$0xff]  }
  0x34   :  { %1109 = vmatpush2.bf16.msra.mxu1 %v1792_v53  ;;  %997 = vmatprep.subr.bf16.mxu0 %v1793_v54  ;;  %v1894_v53 = vld [vmem:[%s2882_s1 + $0x3ec] ss:$16 sps:$4 sm:$0xff]   ;;  %v2503_v54 = vld [vmem:[%s2883_s0 + $0x80] ss:$16 sps:$4 sm:$0xff]  }
  0x35   :  { %1110 = vmatprep.subr.bf16.mxu1 %v1795_v55  ;;  %v2508_v55 = vld [vmem:[%s2883_s0 + $0x88] ss:$16 sps:$4 sm:$0xff]  }
  0x37   :  { %998 = vmatpush2.bf16.msra.mxu0 %v1797_v56  ;;  %v1889_v56 = vld [vmem:[%s2882_s1 + $0x1e8] ss:$16 sps:$4 sm:$0xff]  }
  0x38   :  { %1111 = vmatpush2.bf16.msra.mxu1 %v1798_v57  ;;  %999 = vmatprep.subr.bf16.mxu0 %v1799_v58  ;;  %v1892_v57 = vld [vmem:[%s2882_s1 + $0x3e8] ss:$16 sps:$4 sm:$0xff]   ;;  %v1897_v58 = vld [vmem:[%s2882_s1 + $0x1cc] ss:$16 sps:$4 sm:$0xff]  }
  0x39   :  { %1112 = vmatprep.subr.bf16.mxu1 %v1801_v59  ;;  %v1900_v59 = vld [vmem:[%s2882_s1 + $0x3cc] ss:$16 sps:$4 sm:$0xff]  }
  0x3b   :  { %1000 = vmatpush2.bf16.msra.mxu0 %v1803_v60  ;;  %v2525_v60 = vld [vmem:[%s2883_s0 + $0xa4] ss:$16 sps:$4 sm:$0xff]  }
  0x3c   :  { %1113 = vmatpush2.bf16.msra.mxu1 %v1804_v61  ;;  %1001 = vmatprep.subr.bf16.mxu0 %v1805_v62  ;;  %v2530_v61 = vld [vmem:[%s2883_s0 + $0xac] ss:$16 sps:$4 sm:$0xff]   ;;  %v1895_v62 = vld [vmem:[%s2882_s1 + $0x1c8] ss:$16 sps:$4 sm:$0xff]  }
  0x3d   :  { %1114 = vmatprep.subr.bf16.mxu1 %v1807_v63  ;;  %v1898_v63 = vld [vmem:[%s2882_s1 + $0x3c8] ss:$16 sps:$4 sm:$0xff]  }
  0x3f   :  { %1002 = vmatpush2.bf16.msra.mxu0 %v1809_v0  ;;  %v1909_v0 = vld [vmem:[%s2882_s1 + $0x1ac] ss:$16 sps:$4 sm:$0xff]  }
  0x40   :  { %1115 = vmatpush2.bf16.msra.mxu1 %v1810_v1  ;;  %1197 = vmatprep.subr.bf16.mxu0 %v1819_v2  ;;  %v1912_v1 = vld [vmem:[%s2882_s1 + $0x3ac] ss:$16 sps:$4 sm:$0xff]   ;;  %v2551_v2 = vld [vmem:[%s2883_s0 + $0xa0] ss:$16 sps:$4 sm:$0xff]  }
  0x41   :  { %1310 = vmatprep.subr.bf16.mxu1 %v1822_v3  ;;  %v2556_v3 = vld [vmem:[%s2883_s0 + $0xa8] ss:$16 sps:$4 sm:$0xff]  }
  0x42   :  { %1004 = vmatmul.mubr.bf16.vlgmr.msra.gmra.mxu0 %v2311_v4 }
  0x43   :  { %1117 = vmatmul.mubr.bf16.vlgmr.msra.gmra.mxu1 %v2316_v5  ;;  %1198 = vmatpush1.bf16.msra.mxu0 %v1817_v6  ;;  %v1907_v6 = vld [vmem:[%s2882_s1 + $0x1a8] ss:$16 sps:$4 sm:$0xff]  }
  0x44   :  { %1311 = vmatpush1.bf16.msra.mxu1 %v1820_v7  ;;  %1199 = vmatprep.subr.bf16.mxu0 %v1825_v8  ;;  %v1910_v7 = vld [vmem:[%s2882_s1 + $0x3a8] ss:$16 sps:$4 sm:$0xff]   ;;  %v1915_v8 = vld [vmem:[%s2882_s1 + $0x18c] ss:$16 sps:$4 sm:$0xff]  }
  0x45   :  { %1312 = vmatprep.subr.bf16.mxu1 %v1828_v9  ;;  %1013 = vmatprep.mubr.bf16.mxu0 %v2333_v10  ;;  %v1918_v9 = vld [vmem:[%s2882_s1 + $0x38c] ss:$16 sps:$4 sm:$0xff]  }
  0x46   :  { %1126 = vmatprep.mubr.bf16.mxu1 %v2338_v11 }
  0x47   :  { %1200 = vmatpush1.bf16.msra.mxu0 %v1823_v12  ;;  %v2573_v12 = vld [vmem:[%s2883_s0 + $0xc4] ss:$16 sps:$4 sm:$0xff]  }
  0x48   :  { %1313 = vmatpush1.bf16.msra.mxu1 %v1826_v13  ;;  %1201 = vmatprep.subr.bf16.mxu0 %v1837_v14  ;;  %v2578_v13 = vld [vmem:[%s2883_s0 + $0xcc] ss:$16 sps:$4 sm:$0xff]   ;;  %v1913_v14 = vld [vmem:[%s2882_s1 + $0x188] ss:$16 sps:$4 sm:$0xff]  }
  0x49   :  { %1314 = vmatprep.subr.bf16.mxu1 %v1840_v15  ;;  %v1916_v15 = vld [vmem:[%s2882_s1 + $0x388] ss:$16 sps:$4 sm:$0xff]  }
  0x4a   :  { %1014 = vmatmul.mubr.bf16.gmra.mxu0 %v2359_v16 }
  0x4b   :  { %1127 = vmatmul.mubr.bf16.gmra.mxu1 %v2364_v17  ;;  %1202 = vmatpush1.bf16.msra.mxu0 %v1835_v18  ;;  %v1927_v18 = vld [vmem:[%s2882_s1 + $0x16c] ss:$16 sps:$4 sm:$0xff]  }
  0x4c   :  { %1315 = vmatpush1.bf16.msra.mxu1 %v1838_v19  ;;  %1203 = vmatprep.subr.bf16.mxu0 %v1843_v20  ;;  %v1930_v19 = vld [vmem:[%s2882_s1 + $0x36c] ss:$16 sps:$4 sm:$0xff]   ;;  %v2599_v20 = vld [vmem:[%s2883_s0 + $0xc0] ss:$16 sps:$4 sm:$0xff]  }
  0x4d   :  { %1316 = vmatprep.subr.bf16.mxu1 %v1846_v21  ;;  %1023 = vmatprep.mubr.bf16.mxu0 %v2381_v22  ;;  %v2604_v21 = vld [vmem:[%s2883_s0 + $0xc8] ss:$16 sps:$4 sm:$0xff]  }
  0x4e   :  { %1136 = vmatprep.mubr.bf16.mxu1 %v2386_v23 }
  0x4f   :  { %1204 = vmatpush1.bf16.msra.mxu0 %v1841_v24  ;;  %v1925_v24 = vld [vmem:[%s2882_s1 + $0x168] ss:$16 sps:$4 sm:$0xff]  }
  0x50   :  { %1317 = vmatpush1.bf16.msra.mxu1 %v1844_v25  ;;  %1205 = vmatprep.subr.bf16.mxu0 %v1855_v26  ;;  %v1928_v25 = vld [vmem:[%s2882_s1 + $0x368] ss:$16 sps:$4 sm:$0xff]   ;;  %v1933_v26 = vld [vmem:[%s2882_s1 + $0x14c] ss:$16 sps:$4 sm:$0xff]  }
  0x51   :  { %1318 = vmatprep.subr.bf16.mxu1 %v1858_v27  ;;  %v1936_v27 = vld [vmem:[%s2882_s1 + $0x34c] ss:$16 sps:$4 sm:$0xff]  }
  0x52   :  { %1024 = vmatmul.mubr.bf16.gmra.mxu0 %v2407_v28 }
  0x53   :  { %1137 = vmatmul.mubr.bf16.gmra.mxu1 %v2412_v29  ;;  %1206 = vmatpush1.bf16.msra.mxu0 %v1853_v30  ;;  %v1937_v30 = vld [vmem:[%s2883_s0 + $0xe4] ss:$16 sps:$4 sm:$0xff]  }
  0x54   :  { %1319 = vmatpush1.bf16.msra.mxu1 %v1856_v31  ;;  %1207 = vmatprep.subr.bf16.mxu0 %v1861_v32  ;;  %v1939_v31 = vld [vmem:[%s2883_s0 + $0xec] ss:$16 sps:$4 sm:$0xff]   ;;  %v1931_v32 = vld [vmem:[%s2882_s1 + $0x148] ss:$16 sps:$4 sm:$0xff]  }
  0x55   :  { %1320 = vmatprep.subr.bf16.mxu1 %v1864_v33  ;;  %1033 = vmatprep.mubr.bf16.mxu0 %v2429_v34  ;;  %v1934_v33 = vld [vmem:[%s2882_s1 + $0x348] ss:$16 sps:$4 sm:$0xff]  }
  0x56   :  { %1146 = vmatprep.mubr.bf16.mxu1 %v2434_v35 }
  0x57   :  { %1208 = vmatpush1.bf16.msra.mxu0 %v1859_v36  ;;  %v1945_v36 = vld [vmem:[%s2882_s1 + $0x12c] ss:$16 sps:$4 sm:$0xff]  }
  0x58   :  { %1321 = vmatpush1.bf16.msra.mxu1 %v1862_v37  ;;  %1209 = vmatprep.subr.bf16.mxu0 %v1873_v38  ;;  %v1948_v37 = vld [vmem:[%s2882_s1 + $0x32c] ss:$16 sps:$4 sm:$0xff]   ;;  %v1941_v38 = vld [vmem:[%s2883_s0 + $0xe0] ss:$16 sps:$4 sm:$0xff]  }
  0x59   :  { %1322 = vmatprep.subr.bf16.mxu1 %v1876_v39  ;;  %v1942_v39 = vld [vmem:[%s2883_s0 + $0xe8] ss:$16 sps:$4 sm:$0xff]  }
  0x5a   :  { %1034 = vmatmul.mubr.bf16.gmra.mxu0 %v2455_v40 }
  0x5b   :  { %1147 = vmatmul.mubr.bf16.gmra.mxu1 %v2460_v41  ;;  %1210 = vmatpush1.bf16.msra.mxu0 %v1871_v42  ;;  %v1943_v42 = vld [vmem:[%s2882_s1 + $0x128] ss:$16 sps:$4 sm:$0xff]  }
  0x5c   :  { %1323 = vmatpush1.bf16.msra.mxu1 %v1874_v43  ;;  %1211 = vmatprep.subr.bf16.mxu0 %v1879_v44  ;;  %v1946_v43 = vld [vmem:[%s2882_s1 + $0x328] ss:$16 sps:$4 sm:$0xff]   ;;  %v1951_v44 = vld [vmem:[%s2882_s1 + $0x10c] ss:$16 sps:$4 sm:$0xff]  }
  0x5d   :  { %1324 = vmatprep.subr.bf16.mxu1 %v1882_v45  ;;  %1043 = vmatprep.mubr.bf16.mxu0 %v2477_v46  ;;  %v1954_v45 = vld [vmem:[%s2882_s1 + $0x30c] ss:$16 sps:$4 sm:$0xff]  }
  0x5e   :  { %1156 = vmatprep.mubr.bf16.mxu1 %v2482_v47 }
  0x5f   :  { %1212 = vmatpush1.bf16.msra.mxu0 %v1877_v48  ;;  %v1949_v48 = vld [vmem:[%s2882_s1 + $0x108] ss:$16 sps:$4 sm:$0xff]  }
  0x60   :  { %1325 = vmatpush1.bf16.msra.mxu1 %v1880_v50  ;;  %1213 = vmatprep.subr.bf16.mxu0 %v1891_v52  ;;  %v1952_v50 = vld [vmem:[%s2882_s1 + $0x308] ss:$16 sps:$4 sm:$0xff]  }
  0x61   :  { %1326 = vmatprep.subr.bf16.mxu1 %v1894_v53 }
  0x62   :  { %1044 = vmatmul.mubr.bf16.gmra.mxu0 %v2503_v54 }
  0x63   :  { %1157 = vmatmul.mubr.bf16.gmra.mxu1 %v2508_v55  ;;  %1214 = vmatpush2.bf16.msra.mxu0 %v1889_v56 }
  0x64   :  { %1327 = vmatpush2.bf16.msra.mxu1 %v1892_v57  ;;  %1215 = vmatprep.subr.bf16.mxu0 %v1897_v58 }
  0x65   :  { %1328 = vmatprep.subr.bf16.mxu1 %v1900_v59  ;;  %1053 = vmatprep.mubr.bf16.mxu0 %v2525_v60 }
  0x66   :  { %1166 = vmatprep.mubr.bf16.mxu1 %v2530_v61 }
  0x67   :  { %1216 = vmatpush2.bf16.msra.mxu0 %v1895_v62 }
  0x68   :  { %1329 = vmatpush2.bf16.msra.mxu1 %v1898_v63  ;;  %1217 = vmatprep.subr.bf16.mxu0 %v1909_v0 }
  0x69   :  { %1330 = vmatprep.subr.bf16.mxu1 %v1912_v1 }
  0x6a   :  { %1054 = vmatmul.mubr.bf16.gmra.mxu0 %v2551_v2 }
  0x6b   :  { %1167 = vmatmul.mubr.bf16.gmra.mxu1 %v2556_v3  ;;  %1218 = vmatpush2.bf16.msra.mxu0 %v1907_v6 }
  0x6c   :  { %1331 = vmatpush2.bf16.msra.mxu1 %v1910_v7  ;;  %1219 = vmatprep.subr.bf16.mxu0 %v1915_v8 }
  0x6d   :  { %1332 = vmatprep.subr.bf16.mxu1 %v1918_v9  ;;  %1063 = vmatprep.mubr.bf16.mxu0 %v2573_v12 }
  0x6e   :  { %1176 = vmatprep.mubr.bf16.mxu1 %v2578_v13 }
  0x6f   :  { %1220 = vmatpush2.bf16.msra.mxu0 %v1913_v14 }
  0x70   :  { %1333 = vmatpush2.bf16.msra.mxu1 %v1916_v15  ;;  %1221 = vmatprep.subr.bf16.mxu0 %v1927_v18 }
  0x71   :  { %1334 = vmatprep.subr.bf16.mxu1 %v1930_v19 }
  0x72   :  { %1064 = vmatmul.mubr.bf16.gmra.mxu0 %v2599_v20 }
  0x73   :  { %1177 = vmatmul.mubr.bf16.gmra.mxu1 %v2604_v21  ;;  %1222 = vmatpush2.bf16.msra.mxu0 %v1925_v24 }
  0x74   :  { %1335 = vmatpush2.bf16.msra.mxu1 %v1928_v25  ;;  %1223 = vmatprep.subr.bf16.mxu0 %v1933_v26 }
  0x75   :  { %1336 = vmatprep.subr.bf16.mxu1 %v1936_v27  ;;  %1073 = vmatprep.mubr.bf16.mxu0 %v1937_v30 }
  0x76   :  { %1186 = vmatprep.mubr.bf16.mxu1 %v1939_v31 }
  0x77   :  { %1224 = vmatpush2.bf16.msra.mxu0 %v1931_v32 }
  0x78   :  { %1337 = vmatpush2.bf16.msra.mxu1 %v1934_v33  ;;  %1225 = vmatprep.subr.bf16.mxu0 %v1945_v36 }
  0x79   :  { %1338 = vmatprep.subr.bf16.mxu1 %v1948_v37 }
  0x7a   :  { %1074 = vmatmul.mubr.bf16.gmra.mxu0 %v1941_v38 }
  0x7b   :  { %1187 = vmatmul.mubr.bf16.gmra.mxu1 %v1942_v39  ;;  %1226 = vmatpush2.bf16.msra.mxu0 %v1943_v42 }
  0x7c   :  { %1339 = vmatpush2.bf16.msra.mxu1 %v1946_v43  ;;  %1227 = vmatprep.subr.bf16.mxu0 %v1951_v44 }
  0x7d   :  { %1340 = vmatprep.subr.bf16.mxu1 %v1954_v45  ;;  %1229 = vmatprep.mubr.bf16.mxu0 %v2248_v49 }
  0x7e   :  { %1342 = vmatprep.mubr.bf16.mxu1 %v2256_v51 }
  0x7f   :  { %1228 = vmatpush2.bf16.msra.mxu0 %v1949_v48 }
  0x80   :  { %1341 = vmatpush2.bf16.msra.mxu1 %v1952_v50 }
  0x82   :  { %1230 = vmatmul.mubr.bf16.vlgmr.msra.gmra.mxu0 %v2311_v4 }
  0x83   :  { %1343 = vmatmul.mubr.bf16.vlgmr.msra.gmra.mxu1 %v2316_v5  ;;  %1239 = vmatprep.mubr.bf16.mxu0 %v2333_v10 }
  0x84   :  { %1352 = vmatprep.mubr.bf16.mxu1 %v2338_v11 }
  0x8a   :  { %1240 = vmatmul.mubr.bf16.gmra.mxu0 %v2359_v16 }
  0x8b   :  { %1353 = vmatmul.mubr.bf16.gmra.mxu1 %v2364_v17  ;;  %1249 = vmatprep.mubr.bf16.mxu0 %v2381_v22 }
  0x8c   :  { %1362 = vmatprep.mubr.bf16.mxu1 %v2386_v23 }
  0x92   :  { %1250 = vmatmul.mubr.bf16.gmra.mxu0 %v2407_v28 }
  0x93   :  { %1363 = vmatmul.mubr.bf16.gmra.mxu1 %v2412_v29  ;;  %1259 = vmatprep.mubr.bf16.mxu0 %v2429_v34 }
  0x94   :  { %1372 = vmatprep.mubr.bf16.mxu1 %v2434_v35 }
  0x9a   :  { %1260 = vmatmul.mubr.bf16.gmra.mxu0 %v2455_v40 }
  0x9b   :  { %1373 = vmatmul.mubr.bf16.gmra.mxu1 %v2460_v41  ;;  %1269 = vmatprep.mubr.bf16.mxu0 %v2477_v46 }
  0x9c   :  { %1382 = vmatprep.mubr.bf16.mxu1 %v2482_v47 }
  0xa2   :  { %1270 = vmatmul.mubr.bf16.gmra.mxu0 %v2503_v54 }
  0xa3   :  { %1383 = vmatmul.mubr.bf16.gmra.mxu1 %v2508_v55  ;;  %1279 = vmatprep.mubr.bf16.mxu0 %v2525_v60 }
  0xa4   :  { %1392 = vmatprep.mubr.bf16.mxu1 %v2530_v61 }
  0xaa   :  { %1280 = vmatmul.mubr.bf16.gmra.mxu0 %v2551_v2 }
  0xab   :  { %1393 = vmatmul.mubr.bf16.gmra.mxu1 %v2556_v3  ;;  %1289 = vmatprep.mubr.bf16.mxu0 %v2573_v12 }
  0xac   :  { %1402 = vmatprep.mubr.bf16.mxu1 %v2578_v13 }
  0xb2   :  { %1290 = vmatmul.mubr.bf16.gmra.mxu0 %v2599_v20 }
  0xb3   :  { %1403 = vmatmul.mubr.bf16.gmra.mxu1 %v2604_v21  ;;  %1299 = vmatprep.mubr.bf16.mxu0 %v1937_v30 }
  0xb4   :  { %1412 = vmatprep.mubr.bf16.mxu1 %v1939_v31 }
  0xba   :  { %1300 = vmatmul.mubr.bf16.gmra.mxu0 %v1941_v38 }
  0xbb   :  { %1413 = vmatmul.mubr.bf16.gmra.mxu1 %v1942_v39 }
 0x102   :  { %v1005_v49 = vpop.f32.mrf.mxu0 }
 0x103   :  { %v1118_v51 = vpop.f32.mrf.mxu1 }
 0x104   :  { %v1119_v4 = vadd.f32 %v1118_v51, %v1005_v49  ;;  %v1007_v5 = vpop.f32.mrf.mxu0 }
 0x105   :  { %v1120_v10 = vpop.f32.mrf.mxu1 }
 0x106   :  { %1955 = vtanh.f32 %v1119_v4  ;;  %v1121_v11 = vadd.f32 %v1120_v10, %v1007_v5  ;;  %v1009_v16 = vpop.f32.mrf.mxu0 }
 0x107   :  { %v1122_v17 = vpop.f32.mrf.mxu1 }
 0x108   :  { %1957 = vtanh.f32 %v1121_v11  ;;  %v1123_v22 = vadd.f32 %v1122_v17, %v1009_v16  ;;  %v1011_v23 = vpop.f32.mrf.mxu0 }
 0x109   :  { %v1124_v28 = vpop.f32.mrf.mxu1 }
 0x10a   :  { %1959 = vtanh.f32 %v1123_v22  ;;  %v1125_v29 = vadd.f32 %v1124_v28, %v1011_v23  ;;  %v1015_v34 = vpop.f32.mrf.mxu0 }
 0x10b   :  { %v1128_v35 = vpop.f32.mrf.mxu1 }
 0x10c   :  { %1961 = vtanh.f32 %v1125_v29  ;;  %v1129_v40 = vadd.f32 %v1128_v35, %v1015_v34  ;;  %v1017_v41 = vpop.f32.mrf.mxu0 }
 0x10d   :  { %v1130_v46 = vpop.f32.mrf.mxu1 }
 0x10e   :  { %1963 = vtanh.f32 %v1129_v40  ;;  %v1131_v47 = vadd.f32 %v1130_v46, %v1017_v41  ;;  %v1019_v52 = vpop.f32.mrf.mxu0 }
 0x10f   :  { %v1132_v53 = vpop.f32.mrf.mxu1 }
 0x110   :  { %1965 = vtanh.f32 %v1131_v47  ;;  %v1133_v54 = vadd.f32 %v1132_v53, %v1019_v52  ;;  %v1021_v55 = vpop.f32.mrf.mxu0 }
 0x111   :  { %v1134_v56 = vpop.f32.mrf.mxu1 }
 0x112   :  { %1967 = vtanh.f32 %v1133_v54  ;;  %v1135_v57 = vadd.f32 %v1134_v56, %v1021_v55  ;;  %v1025_v59 = vpop.f32.mrf.mxu0 }
 0x113   :  { %v1956_v58 = vpop.eup %1955  ;;  %v1138_v60 = vpop.f32.mrf.mxu1 }
 0x114   :  { %1487 = vst [vmem:[%s2884_s2] sm:$0xff] %v1956_v58  ;;  %1969 = vtanh.f32 %v1135_v57  ;;  %v1139_v61 = vadd.f32 %v1138_v60, %v1025_v59  ;;  %v1027_v63 = vpop.f32.mrf.mxu0 }
 0x115   :  { %v1958_v62 = vpop.eup %1957  ;;  %v1140_v0 = vpop.f32.mrf.mxu1 }
 0x116   :  { %1488 = vst [vmem:[%s2884_s2 + $0x8] sm:$0xff] %v1958_v62  ;;  %1971 = vtanh.f32 %v1139_v61  ;;  %v1141_v1 = vadd.f32 %v1140_v0, %v1027_v63  ;;  %v1029_v3 = vpop.f32.mrf.mxu0 }
 0x117   :  { %v1960_v2 = vpop.eup %1959  ;;  %v1142_v6 = vpop.f32.mrf.mxu1 }
 0x118   :  { %1491 = vst [vmem:[%s2884_s2 + $0x20] sm:$0xff] %v1960_v2  ;;  %1973 = vtanh.f32 %v1141_v1  ;;  %v1143_v7 = vadd.f32 %v1142_v6, %v1029_v3  ;;  %v1031_v9 = vpop.f32.mrf.mxu0 }
 0x119   :  { %v1962_v8 = vpop.eup %1961  ;;  %v1144_v12 = vpop.f32.mrf.mxu1 }
 0x11a   :  { %1492 = vst [vmem:[%s2884_s2 + $0x28] sm:$0xff] %v1962_v8  ;;  %1975 = vtanh.f32 %v1143_v7  ;;  %v1145_v13 = vadd.f32 %v1144_v12, %v1031_v9  ;;  %v1035_v15 = vpop.f32.mrf.mxu0 }
 0x11b   :  { %v1964_v14 = vpop.eup %1963  ;;  %v1148_v18 = vpop.f32.mrf.mxu1 }
 0x11c   :  { %1495 = vst [vmem:[%s2884_s2 + $0x40] sm:$0xff] %v1964_v14  ;;  %1977 = vtanh.f32 %v1145_v13  ;;  %v1149_v19 = vadd.f32 %v1148_v18, %v1035_v15  ;;  %v1037_v21 = vpop.f32.mrf.mxu0 }
 0x11d   :  { %v1966_v20 = vpop.eup %1965  ;;  %v1150_v24 = vpop.f32.mrf.mxu1 }
 0x11e   :  { %1496 = vst [vmem:[%s2884_s2 + $0x48] sm:$0xff] %v1966_v20  ;;  %1979 = vtanh.f32 %v1149_v19  ;;  %v1151_v25 = vadd.f32 %v1150_v24, %v1037_v21  ;;  %v1039_v27 = vpop.f32.mrf.mxu0 }
 0x11f   :  { %v1968_v26 = vpop.eup %1967  ;;  %v1152_v30 = vpop.f32.mrf.mxu1 }
 0x120   :  { %1499 = vst [vmem:[%s2884_s2 + $0x60] sm:$0xff] %v1968_v26  ;;  %1981 = vtanh.f32 %v1151_v25  ;;  %v1153_v31 = vadd.f32 %v1152_v30, %v1039_v27  ;;  %v1041_v33 = vpop.f32.mrf.mxu0 }
 0x121   :  { %v1970_v32 = vpop.eup %1969  ;;  %v1154_v36 = vpop.f32.mrf.mxu1 }
 0x122   :  { %1500 = vst [vmem:[%s2884_s2 + $0x68] sm:$0xff] %v1970_v32  ;;  %1983 = vtanh.f32 %v1153_v31  ;;  %v1155_v37 = vadd.f32 %v1154_v36, %v1041_v33  ;;  %v1045_v39 = vpop.f32.mrf.mxu0 }
 0x123   :  { %v1972_v38 = vpop.eup %1971  ;;  %v1158_v42 = vpop.f32.mrf.mxu1 }
 0x124   :  { %1503 = vst [vmem:[%s2884_s2 + $0x80] sm:$0xff] %v1972_v38  ;;  %1985 = vtanh.f32 %v1155_v37  ;;  %v1159_v43 = vadd.f32 %v1158_v42, %v1045_v39  ;;  %v1047_v45 = vpop.f32.mrf.mxu0 }
 0x125   :  { %v1974_v44 = vpop.eup %1973  ;;  %v1160_v48 = vpop.f32.mrf.mxu1 }
 0x126   :  { %1504 = vst [vmem:[%s2884_s2 + $0x88] sm:$0xff] %v1974_v44  ;;  %1987 = vtanh.f32 %v1159_v43  ;;  %v1161_v50 = vadd.f32 %v1160_v48, %v1047_v45  ;;  %v1049_v51 = vpop.f32.mrf.mxu0 }
 0x127   :  { %v1976_v49 = vpop.eup %1975  ;;  %v1162_v4 = vpop.f32.mrf.mxu1 }
 0x128   :  { %1507 = vst [vmem:[%s2884_s2 + $0xa0] sm:$0xff] %v1976_v49  ;;  %1989 = vtanh.f32 %v1161_v50  ;;  %v1163_v5 = vadd.f32 %v1162_v4, %v1049_v51  ;;  %v1051_v11 = vpop.f32.mrf.mxu0 }
 0x129   :  { %v1978_v10 = vpop.eup %1977  ;;  %v1164_v16 = vpop.f32.mrf.mxu1 }
 0x12a   :  { %1508 = vst [vmem:[%s2884_s2 + $0xa8] sm:$0xff] %v1978_v10  ;;  %1991 = vtanh.f32 %v1163_v5  ;;  %v1165_v17 = vadd.f32 %v1164_v16, %v1051_v11  ;;  %v1055_v23 = vpop.f32.mrf.mxu0 }
 0x12b   :  { %v1980_v22 = vpop.eup %1979  ;;  %v1168_v28 = vpop.f32.mrf.mxu1 }
 0x12c   :  { %1511 = vst [vmem:[%s2884_s2 + $0xc0] sm:$0xff] %v1980_v22  ;;  %1993 = vtanh.f32 %v1165_v17  ;;  %v1169_v29 = vadd.f32 %v1168_v28, %v1055_v23  ;;  %v1057_v35 = vpop.f32.mrf.mxu0 }
 0x12d   :  { %v1982_v34 = vpop.eup %1981  ;;  %v1170_v40 = vpop.f32.mrf.mxu1 }
 0x12e   :  { %1512 = vst [vmem:[%s2884_s2 + $0xc8] sm:$0xff] %v1982_v34  ;;  %1995 = vtanh.f32 %v1169_v29  ;;  %v1171_v41 = vadd.f32 %v1170_v40, %v1057_v35  ;;  %v1059_v47 = vpop.f32.mrf.mxu0 }
 0x12f   :  { %v1984_v46 = vpop.eup %1983  ;;  %v1172_v52 = vpop.f32.mrf.mxu1 }
 0x130   :  { %1515 = vst [vmem:[%s2884_s2 + $0xe0] sm:$0xff] %v1984_v46  ;;  %1997 = vtanh.f32 %v1171_v41  ;;  %v1173_v53 = vadd.f32 %v1172_v52, %v1059_v47  ;;  %v1061_v55 = vpop.f32.mrf.mxu0 }
 0x131   :  { %v1986_v54 = vpop.eup %1985  ;;  %v1174_v56 = vpop.f32.mrf.mxu1 }
 0x132   :  { %1516 = vst [vmem:[%s2884_s2 + $0xe8] sm:$0xff] %v1986_v54  ;;  %1999 = vtanh.f32 %v1173_v53  ;;  %v1175_v57 = vadd.f32 %v1174_v56, %v1061_v55  ;;  %v1065_v59 = vpop.f32.mrf.mxu0 }
 0x133   :  { %v1988_v58 = vpop.eup %1987  ;;  %v1178_v60 = vpop.f32.mrf.mxu1 }
 0x134   :  { %1519 = vst [vmem:[%s2884_s2 + $0x100] sm:$0xff] %v1988_v58  ;;  %2001 = vtanh.f32 %v1175_v57  ;;  %v1179_v61 = vadd.f32 %v1178_v60, %v1065_v59  ;;  %v1067_v63 = vpop.f32.mrf.mxu0 }
 0x135   :  { %v1990_v62 = vpop.eup %1989  ;;  %v1180_v0 = vpop.f32.mrf.mxu1 }
 0x136   :  { %1520 = vst [vmem:[%s2884_s2 + $0x108] sm:$0xff] %v1990_v62  ;;  %2003 = vtanh.f32 %v1179_v61  ;;  %v1181_v1 = vadd.f32 %v1180_v0, %v1067_v63  ;;  %v1069_v3 = vpop.f32.mrf.mxu0 }
 0x137   :  { %v1992_v2 = vpop.eup %1991  ;;  %v1182_v6 = vpop.f32.mrf.mxu1 }
 0x138   :  { %1523 = vst [vmem:[%s2884_s2 + $0x120] sm:$0xff] %v1992_v2  ;;  %2005 = vtanh.f32 %v1181_v1  ;;  %v1183_v7 = vadd.f32 %v1182_v6, %v1069_v3  ;;  %v1071_v9 = vpop.f32.mrf.mxu0 }
 0x139   :  { %v1994_v8 = vpop.eup %1993  ;;  %v1184_v12 = vpop.f32.mrf.mxu1 }
 0x13a   :  { %1524 = vst [vmem:[%s2884_s2 + $0x128] sm:$0xff] %v1994_v8  ;;  %2007 = vtanh.f32 %v1183_v7  ;;  %v1185_v13 = vadd.f32 %v1184_v12, %v1071_v9  ;;  %v1075_v15 = vpop.f32.mrf.mxu0 }
 0x13b   :  { %v1996_v14 = vpop.eup %1995  ;;  %v1188_v18 = vpop.f32.mrf.mxu1 }
 0x13c   :  { %1527 = vst [vmem:[%s2884_s2 + $0x140] sm:$0xff] %v1996_v14  ;;  %2009 = vtanh.f32 %v1185_v13  ;;  %v1189_v19 = vadd.f32 %v1188_v18, %v1075_v15  ;;  %v1077_v21 = vpop.f32.mrf.mxu0 }
 0x13d   :  { %v1998_v20 = vpop.eup %1997  ;;  %v1190_v24 = vpop.f32.mrf.mxu1 }
 0x13e   :  { %1528 = vst [vmem:[%s2884_s2 + $0x148] sm:$0xff] %v1998_v20  ;;  %2011 = vtanh.f32 %v1189_v19  ;;  %v1191_v25 = vadd.f32 %v1190_v24, %v1077_v21  ;;  %v1079_v27 = vpop.f32.mrf.mxu0 }
 0x13f   :  { %v2000_v26 = vpop.eup %1999  ;;  %v1192_v30 = vpop.f32.mrf.mxu1 }
 0x140   :  { %1531 = vst [vmem:[%s2884_s2 + $0x160] sm:$0xff] %v2000_v26  ;;  %2013 = vtanh.f32 %v1191_v25  ;;  %v1193_v31 = vadd.f32 %v1192_v30, %v1079_v27  ;;  %v1081_v33 = vpop.f32.mrf.mxu0 }
 0x141   :  { %v2002_v32 = vpop.eup %2001  ;;  %v1194_v36 = vpop.f32.mrf.mxu1 }
 0x142   :  { %1532 = vst [vmem:[%s2884_s2 + $0x168] sm:$0xff] %v2002_v32  ;;  %2015 = vtanh.f32 %v1193_v31  ;;  %v1195_v37 = vadd.f32 %v1194_v36, %v1081_v33  ;;  %v1231_v39 = vpop.f32.mrf.mxu0 }
 0x143   :  { %v2004_v38 = vpop.eup %2003  ;;  %v1344_v42 = vpop.f32.mrf.mxu1 }
 0x144   :  { %1535 = vst [vmem:[%s2884_s2 + $0x180] sm:$0xff] %v2004_v38  ;;  %2017 = vtanh.f32 %v1195_v37  ;;  %v1345_v43 = vadd.f32 %v1344_v42, %v1231_v39  ;;  %v1233_v45 = vpop.f32.mrf.mxu0 }
 0x145   :  { %v2006_v44 = vpop.eup %2005  ;;  %v1346_v48 = vpop.f32.mrf.mxu1 }
 0x146   :  { %1536 = vst [vmem:[%s2884_s2 + $0x188] sm:$0xff] %v2006_v44  ;;  %2019 = vtanh.f32 %v1345_v43  ;;  %v1347_v50 = vadd.f32 %v1346_v48, %v1233_v45  ;;  %v1235_v51 = vpop.f32.mrf.mxu0 }
 0x147   :  { %v2008_v49 = vpop.eup %2007  ;;  %v1348_v4 = vpop.f32.mrf.mxu1 }
 0x148   :  { %1539 = vst [vmem:[%s2884_s2 + $0x1a0] sm:$0xff] %v2008_v49  ;;  %2021 = vtanh.f32 %v1347_v50  ;;  %v1349_v5 = vadd.f32 %v1348_v4, %v1235_v51  ;;  %v1237_v11 = vpop.f32.mrf.mxu0 }
 0x149   :  { %v2010_v10 = vpop.eup %2009  ;;  %v1350_v16 = vpop.f32.mrf.mxu1 }
 0x14a   :  { %1540 = vst [vmem:[%s2884_s2 + $0x1a8] sm:$0xff] %v2010_v10  ;;  %2023 = vtanh.f32 %v1349_v5  ;;  %v1351_v17 = vadd.f32 %v1350_v16, %v1237_v11  ;;  %v1241_v23 = vpop.f32.mrf.mxu0 }
 0x14b   :  { %v2012_v22 = vpop.eup %2011  ;;  %v1354_v28 = vpop.f32.mrf.mxu1 }
 0x14c   :  { %1543 = vst [vmem:[%s2884_s2 + $0x1c0] sm:$0xff] %v2012_v22  ;;  %2025 = vtanh.f32 %v1351_v17  ;;  %v1355_v29 = vadd.f32 %v1354_v28, %v1241_v23  ;;  %v1243_v35 = vpop.f32.mrf.mxu0 }
 0x14d   :  { %v2014_v34 = vpop.eup %2013  ;;  %v1356_v40 = vpop.f32.mrf.mxu1 }
 0x14e   :  { %1544 = vst [vmem:[%s2884_s2 + $0x1c8] sm:$0xff] %v2014_v34  ;;  %2027 = vtanh.f32 %v1355_v29  ;;  %v1357_v41 = vadd.f32 %v1356_v40, %v1243_v35  ;;  %v1245_v47 = vpop.f32.mrf.mxu0 }
 0x14f   :  { %v2016_v46 = vpop.eup %2015  ;;  %v1358_v52 = vpop.f32.mrf.mxu1 }
 0x150   :  { %1547 = vst [vmem:[%s2884_s2 + $0x1e0] sm:$0xff] %v2016_v46  ;;  %2029 = vtanh.f32 %v1357_v41  ;;  %v1359_v53 = vadd.f32 %v1358_v52, %v1245_v47  ;;  %v1247_v55 = vpop.f32.mrf.mxu0 }
 0x151   :  { %v2018_v54 = vpop.eup %2017  ;;  %v1360_v56 = vpop.f32.mrf.mxu1 }
 0x152   :  { %1548 = vst [vmem:[%s2884_s2 + $0x1e8] sm:$0xff] %v2018_v54  ;;  %2031 = vtanh.f32 %v1359_v53  ;;  %v1361_v57 = vadd.f32 %v1360_v56, %v1247_v55  ;;  %v1251_v59 = vpop.f32.mrf.mxu0 }
 0x153   :  { %v2020_v58 = vpop.eup %2019  ;;  %v1364_v60 = vpop.f32.mrf.mxu1 }
 0x154   :  { %1489 = vst [vmem:[%s2884_s2 + $0x10] sm:$0xff] %v2020_v58  ;;  %2033 = vtanh.f32 %v1361_v57  ;;  %v1365_v61 = vadd.f32 %v1364_v60, %v1251_v59  ;;  %v1253_v63 = vpop.f32.mrf.mxu0 }
 0x155   :  { %v2022_v62 = vpop.eup %2021  ;;  %v1366_v0 = vpop.f32.mrf.mxu1 }
 0x156   :  { %1490 = vst [vmem:[%s2884_s2 + $0x18] sm:$0xff] %v2022_v62  ;;  %2035 = vtanh.f32 %v1365_v61  ;;  %v1367_v1 = vadd.f32 %v1366_v0, %v1253_v63  ;;  %v1255_v3 = vpop.f32.mrf.mxu0 }
 0x157   :  { %v2024_v2 = vpop.eup %2023  ;;  %v1368_v6 = vpop.f32.mrf.mxu1 }
 0x158   :  { %1493 = vst [vmem:[%s2884_s2 + $0x30] sm:$0xff] %v2024_v2  ;;  %2037 = vtanh.f32 %v1367_v1  ;;  %v1369_v7 = vadd.f32 %v1368_v6, %v1255_v3  ;;  %v1257_v9 = vpop.f32.mrf.mxu0 }
 0x159   :  { %v2026_v8 = vpop.eup %2025  ;;  %v1370_v12 = vpop.f32.mrf.mxu1 }
 0x15a   :  { %1494 = vst [vmem:[%s2884_s2 + $0x38] sm:$0xff] %v2026_v8  ;;  %2039 = vtanh.f32 %v1369_v7  ;;  %v1371_v13 = vadd.f32 %v1370_v12, %v1257_v9  ;;  %v1261_v15 = vpop.f32.mrf.mxu0 }
 0x15b   :  { %v2028_v14 = vpop.eup %2027  ;;  %v1374_v18 = vpop.f32.mrf.mxu1 }
 0x15c   :  { %1497 = vst [vmem:[%s2884_s2 + $0x50] sm:$0xff] %v2028_v14  ;;  %2041 = vtanh.f32 %v1371_v13  ;;  %v1375_v19 = vadd.f32 %v1374_v18, %v1261_v15  ;;  %v1263_v21 = vpop.f32.mrf.mxu0 }
 0x15d   :  { %v2030_v20 = vpop.eup %2029  ;;  %v1376_v24 = vpop.f32.mrf.mxu1 }
 0x15e   :  { %1498 = vst [vmem:[%s2884_s2 + $0x58] sm:$0xff] %v2030_v20  ;;  %2043 = vtanh.f32 %v1375_v19  ;;  %v1377_v25 = vadd.f32 %v1376_v24, %v1263_v21  ;;  %v1265_v27 = vpop.f32.mrf.mxu0 }
 0x15f   :  { %v2032_v26 = vpop.eup %2031  ;;  %v1378_v30 = vpop.f32.mrf.mxu1 }
 0x160   :  { %1501 = vst [vmem:[%s2884_s2 + $0x70] sm:$0xff] %v2032_v26  ;;  %2045 = vtanh.f32 %v1377_v25  ;;  %v1379_v31 = vadd.f32 %v1378_v30, %v1265_v27  ;;  %v1267_v33 = vpop.f32.mrf.mxu0 }
 0x161   :  { %v2034_v32 = vpop.eup %2033  ;;  %v1380_v36 = vpop.f32.mrf.mxu1 }
 0x162   :  { %1502 = vst [vmem:[%s2884_s2 + $0x78] sm:$0xff] %v2034_v32  ;;  %2047 = vtanh.f32 %v1379_v31  ;;  %v1381_v37 = vadd.f32 %v1380_v36, %v1267_v33  ;;  %v1271_v39 = vpop.f32.mrf.mxu0 }
 0x163   :  { %v2036_v38 = vpop.eup %2035  ;;  %v1384_v42 = vpop.f32.mrf.mxu1 }
 0x164   :  { %1505 = vst [vmem:[%s2884_s2 + $0x90] sm:$0xff] %v2036_v38  ;;  %2049 = vtanh.f32 %v1381_v37  ;;  %v1385_v43 = vadd.f32 %v1384_v42, %v1271_v39  ;;  %v1273_v45 = vpop.f32.mrf.mxu0 }
 0x165   :  { %v2038_v44 = vpop.eup %2037  ;;  %v1386_v48 = vpop.f32.mrf.mxu1 }
 0x166   :  { %1506 = vst [vmem:[%s2884_s2 + $0x98] sm:$0xff] %v2038_v44  ;;  %2051 = vtanh.f32 %v1385_v43  ;;  %v1387_v50 = vadd.f32 %v1386_v48, %v1273_v45  ;;  %v1275_v51 = vpop.f32.mrf.mxu0 }
 0x167   :  { %v2040_v49 = vpop.eup %2039  ;;  %v1388_v4 = vpop.f32.mrf.mxu1 }
 0x168   :  { %1509 = vst [vmem:[%s2884_s2 + $0xb0] sm:$0xff] %v2040_v49  ;;  %2053 = vtanh.f32 %v1387_v50  ;;  %v1389_v5 = vadd.f32 %v1388_v4, %v1275_v51  ;;  %v1277_v11 = vpop.f32.mrf.mxu0 }
 0x169   :  { %v2042_v10 = vpop.eup %2041  ;;  %v1390_v16 = vpop.f32.mrf.mxu1 }
 0x16a   :  { %1510 = vst [vmem:[%s2884_s2 + $0xb8] sm:$0xff] %v2042_v10  ;;  %2055 = vtanh.f32 %v1389_v5  ;;  %v1391_v17 = vadd.f32 %v1390_v16, %v1277_v11  ;;  %v1281_v23 = vpop.f32.mrf.mxu0 }
 0x16b   :  { %v2044_v22 = vpop.eup %2043  ;;  %v1394_v28 = vpop.f32.mrf.mxu1 }
 0x16c   :  { %1513 = vst [vmem:[%s2884_s2 + $0xd0] sm:$0xff] %v2044_v22  ;;  %2057 = vtanh.f32 %v1391_v17  ;;  %v1395_v29 = vadd.f32 %v1394_v28, %v1281_v23  ;;  %v1283_v35 = vpop.f32.mrf.mxu0 }
 0x16d   :  { %v2046_v34 = vpop.eup %2045  ;;  %v1396_v40 = vpop.f32.mrf.mxu1 }
 0x16e   :  { %1514 = vst [vmem:[%s2884_s2 + $0xd8] sm:$0xff] %v2046_v34  ;;  %2059 = vtanh.f32 %v1395_v29  ;;  %v1397_v41 = vadd.f32 %v1396_v40, %v1283_v35  ;;  %v1285_v47 = vpop.f32.mrf.mxu0 }
 0x16f   :  { %v2048_v46 = vpop.eup %2047  ;;  %v1398_v52 = vpop.f32.mrf.mxu1 }
 0x170   :  { %1517 = vst [vmem:[%s2884_s2 + $0xf0] sm:$0xff] %v2048_v46  ;;  %2061 = vtanh.f32 %v1397_v41  ;;  %v1399_v53 = vadd.f32 %v1398_v52, %v1285_v47  ;;  %v1287_v55 = vpop.f32.mrf.mxu0 }
 0x171   :  { %v2050_v54 = vpop.eup %2049  ;;  %v1400_v56 = vpop.f32.mrf.mxu1 }
 0x172   :  { %1518 = vst [vmem:[%s2884_s2 + $0xf8] sm:$0xff] %v2050_v54  ;;  %2063 = vtanh.f32 %v1399_v53  ;;  %v1401_v57 = vadd.f32 %v1400_v56, %v1287_v55  ;;  %v1291_v59 = vpop.f32.mrf.mxu0 }
 0x173   :  { %v2052_v58 = vpop.eup %2051  ;;  %v1404_v60 = vpop.f32.mrf.mxu1 }
 0x174   :  { %1521 = vst [vmem:[%s2884_s2 + $0x110] sm:$0xff] %v2052_v58  ;;  %2065 = vtanh.f32 %v1401_v57  ;;  %v1405_v61 = vadd.f32 %v1404_v60, %v1291_v59  ;;  %v1293_v63 = vpop.f32.mrf.mxu0 }
 0x175   :  { %v2054_v62 = vpop.eup %2053  ;;  %v1406_v0 = vpop.f32.mrf.mxu1 }
 0x176   :  { %1522 = vst [vmem:[%s2884_s2 + $0x118] sm:$0xff] %v2054_v62  ;;  %2067 = vtanh.f32 %v1405_v61  ;;  %v1407_v1 = vadd.f32 %v1406_v0, %v1293_v63  ;;  %v1295_v3 = vpop.f32.mrf.mxu0 }
 0x177   :  { %v2056_v2 = vpop.eup %2055  ;;  %v1408_v6 = vpop.f32.mrf.mxu1 }
 0x178   :  { %1525 = vst [vmem:[%s2884_s2 + $0x130] sm:$0xff] %v2056_v2  ;;  %2069 = vtanh.f32 %v1407_v1  ;;  %v1409_v7 = vadd.f32 %v1408_v6, %v1295_v3  ;;  %v1297_v9 = vpop.f32.mrf.mxu0 }
 0x179   :  { %v2058_v8 = vpop.eup %2057  ;;  %v1410_v12 = vpop.f32.mrf.mxu1 }
 0x17a   :  { %1526 = vst [vmem:[%s2884_s2 + $0x138] sm:$0xff] %v2058_v8  ;;  %2071 = vtanh.f32 %v1409_v7  ;;  %v1411_v13 = vadd.f32 %v1410_v12, %v1297_v9  ;;  %v1301_v15 = vpop.f32.mrf.mxu0 }
 0x17b   :  { %v2060_v14 = vpop.eup %2059  ;;  %v1414_v18 = vpop.f32.mrf.mxu1 }
 0x17c   :  { %1529 = vst [vmem:[%s2884_s2 + $0x150] sm:$0xff] %v2060_v14  ;;  %2073 = vtanh.f32 %v1411_v13  ;;  %v1415_v19 = vadd.f32 %v1414_v18, %v1301_v15  ;;  %v1303_v21 = vpop.f32.mrf.mxu0 }
 0x17d   :  { %v2062_v20 = vpop.eup %2061  ;;  %v1416_v24 = vpop.f32.mrf.mxu1 }
 0x17e   :  { %1530 = vst [vmem:[%s2884_s2 + $0x158] sm:$0xff] %v2062_v20  ;;  %2075 = vtanh.f32 %v1415_v19  ;;  %v1417_v25 = vadd.f32 %v1416_v24, %v1303_v21  ;;  %v1305_v27 = vpop.f32.mrf.mxu0 }
 0x17f   :  { %v2064_v26 = vpop.eup %2063  ;;  %v1418_v30 = vpop.f32.mrf.mxu1 }
 0x180   :  { %1533 = vst [vmem:[%s2884_s2 + $0x170] sm:$0xff] %v2064_v26  ;;  %2077 = vtanh.f32 %v1417_v25  ;;  %v1419_v31 = vadd.f32 %v1418_v30, %v1305_v27  ;;  %v1307_v33 = vpop.f32.mrf.mxu0 }
 0x181   :  { %v2066_v32 = vpop.eup %2065  ;;  %v1420_v36 = vpop.f32.mrf.mxu1 }
 0x182   :  { %1534 = vst [vmem:[%s2884_s2 + $0x178] sm:$0xff] %v2066_v32  ;;  %2079 = vtanh.f32 %v1419_v31  ;;  %v1421_v37 = vadd.f32 %v1420_v36, %v1307_v33 }
 0x183   :  { %v2068_v38 = vpop.eup %2067 }
 0x184   :  { %1537 = vst [vmem:[%s2884_s2 + $0x190] sm:$0xff] %v2068_v38  ;;  %2081 = vtanh.f32 %v1421_v37 }
 0x185   :  { %v2070_v39 = vpop.eup %2069 }
 0x186   :  { %1538 = vst [vmem:[%s2884_s2 + $0x198] sm:$0xff] %v2070_v39 }
 0x187   :  { %v2072_v42 = vpop.eup %2071 }
 0x188   :  { %1541 = vst [vmem:[%s2884_s2 + $0x1b0] sm:$0xff] %v2072_v42 }
 0x189   :  { %v2074_v43 = vpop.eup %2073 }
 0x18a   :  { %1542 = vst [vmem:[%s2884_s2 + $0x1b8] sm:$0xff] %v2074_v43 }
 0x18b   :  { %v2076_v44 = vpop.eup %2075 }
 0x18c   :  { %1545 = vst [vmem:[%s2884_s2 + $0x1d0] sm:$0xff] %v2076_v44 }
 0x18d   :  { %v2078_v45 = vpop.eup %2077 }
 0x18e   :  { %1546 = vst [vmem:[%s2884_s2 + $0x1d8] sm:$0xff] %v2078_v45 }
 0x18f   :  { %v2080_v48 = vpop.eup %2079 }
 0x190   :  { %1549 = vst [vmem:[%s2884_s2 + $0x1f0] sm:$0xff] %v2080_v48 }
 0x191   :  { %v2082_v50 = vpop.eup %2081 }
 0x192   :  { %1550 = vst [vmem:[%s2884_s2 + $0x1f8] sm:$0xff] %v2082_v50 }

</bundles_post_ra>
